<compile_context>
chip_gen: v7x
topology: tpu7x:2x2x1
jax: 0.10.0
libtpu: 0.0.40
codegen_flags: <defaults>
</compile_context>

<pallas_src>
import jax
import jax.numpy as jnp
from jax.experimental import pallas as pl
from jax.experimental.pallas import tpu as pltpu

STATE_SPACE = 16    # input_dim
ACTION_SPACE = 4    # output_dim
BATCH = 8

# (in, out) dims of fc1..fc5 and the fused duelling head [fcs | fcp].
_LAYER_DIMS = [
    (STATE_SPACE, 500),          # fc1
    (500, 500),                  # fc2
    (500, 300),                  # fc3
    (300, 200),                  # fc4
    (200, 10),                   # fc5
    (10, 1 + ACTION_SPACE),      # fused head: [fcs (1) | fcp (ACTION_SPACE)]
]
_BIAS_SLAB_SHAPE = (8, 512)      # row r holds layer r's bias, zero padded


def _duelling_kernel(x_ref,
                     w1_ref, w2_ref, w3_ref, w4_ref, w5_ref, wh_ref,
                     bias_ref,
                     out_ref):
    def dense_relu(h, w_ref, row, n_out):
        # bf16 operands on the MXU, f32 accumulation; f32 bias + ReLU on VPU.
        z = jnp.dot(h.astype(jnp.bfloat16), w_ref[...],
                    preferred_element_type=jnp.float32)
        z = z + bias_ref[row:row + 1, :n_out]
        return jnp.maximum(z, 0.0)

    h = x_ref[...]                                    # (B, 16) f32
    h = dense_relu(h, w1_ref, 0, 500)                 # (B, 500)
    h = dense_relu(h, w2_ref, 1, 500)                 # (B, 500)
    h = dense_relu(h, w3_ref, 2, 300)                 # (B, 300)
    h = dense_relu(h, w4_ref, 3, 200)                 # (B, 200)
    h = dense_relu(h, w5_ref, 4, 10)                  # (B, 10)

    zh = dense_relu(h, wh_ref, 5, 1 + ACTION_SPACE)   # (B, 1+A) fused heads
    xs = zh[:, 0:1]                                   # value stream   (B, 1)
    xp = zh[:, 1:1 + ACTION_SPACE]                    # advantage      (B, A)

    # Duelling combine.  Matches torch `xp.mean()`: a GLOBAL scalar mean over
    # both batch and action dims (not a per-sample mean over actions).
    out_ref[...] = xs + xp - jnp.mean(xp)


def pack_params(params):
    """params: [(W, b)] for fc1..fc5, fcs, fcp (float32, W stored as (in, out)).

    Returns (weights, bias_slab):
      weights  : 6 bf16 arrays -- fc1..fc5 plus the fused [fcs | fcp] head.
      bias_slab: (8, 512) f32, row r = layer r's bias, zero padded.
    """
    (w1, b1), (w2, b2), (w3, b3), (w4, b4), (w5, b5), (ws, bs), (wp, bp) = params
    wh = jnp.concatenate([ws, wp], axis=1)            # (10, 1+A)
    bh = jnp.concatenate([bs, bp], axis=1)            # (1, 1+A)

    weights = tuple(w.astype(jnp.bfloat16) for w in (w1, w2, w3, w4, w5, wh))

    bias_slab = jnp.zeros(_BIAS_SLAB_SHAPE, jnp.float32)
    for row, b in enumerate((b1, b2, b3, b4, b5, bh)):
        bias_slab = bias_slab.at[row, : b.shape[-1]].set(b.reshape(-1))
    return weights, bias_slab


@jax.jit
def duelling_dqn_forward(state, weights, bias_slab):
    """state: (B, STATE_SPACE) f32; (weights, bias_slab) from pack_params."""
    batch = state.shape[0]
    macs = sum(fi * fo for fi, fo in _LAYER_DIMS)
    weight_bytes = sum(w.size * w.dtype.itemsize for w in weights)
    bytes_accessed = (weight_bytes
                      + bias_slab.size * bias_slab.dtype.itemsize
                      + state.size * state.dtype.itemsize
                      + batch * ACTION_SPACE * 4)

    vmem = pl.BlockSpec(memory_space=pltpu.MemorySpace.VMEM)
    return pl.pallas_call(
        _duelling_kernel,
        out_shape=jax.ShapeDtypeStruct((batch, ACTION_SPACE), jnp.float32),
        in_specs=[vmem] * (1 + len(weights) + 1),
        out_specs=vmem,
        cost_estimate=pl.CostEstimate(
            flops=2 * batch * macs,
            transcendentals=0,
            bytes_accessed=bytes_accessed),
    )(state, *weights, bias_slab)


def _init_linear(key, fan_in, fan_out):
    # PyTorch nn.Linear default: U(-1/sqrt(fan_in), 1/sqrt(fan_in)) for W and b.
    kw, kb = jax.random.split(key)
    bound = 1.0 / jnp.sqrt(jnp.float32(fan_in))
    w = jax.random.uniform(kw, (fan_in, fan_out), jnp.float32, -bound, bound)
    b = jax.random.uniform(kb, (1, fan_out), jnp.float32, -bound, bound)
    return w, b


def make_params(key):
    dims = [
        (STATE_SPACE, 500),   # fc1
        (500, 500),           # fc2
        (500, 300),           # fc3
        (300, 200),           # fc4
        (200, 10),            # fc5
        (10, 1),              # fcs (value)
        (10, ACTION_SPACE),   # fcp (advantage)
    ]
    keys = jax.random.split(key, len(dims))
    return [_init_linear(k, fi, fo) for k, (fi, fo) in zip(keys, dims)]


def reference_forward(state, params):
    """Pure-JAX reference at the kernel's precision (bf16 weights/activations,
    f32 accumulation); value/advantage heads kept separate."""
    def dense_relu(h, w, b):
        z = jnp.dot(h.astype(jnp.bfloat16), w.astype(jnp.bfloat16),
                    preferred_element_type=jnp.float32) + b
        return jnp.maximum(z, 0.0)

    h = state
    for w, b in params[:5]:
        h = dense_relu(h, w, b)
    xs = dense_relu(h, *params[5])
    xp = dense_relu(h, *params[6])
    return xs + xp - jnp.mean(xp)


if __name__ == "__main__":
    key = jax.random.PRNGKey(0)
    k_params, k_state = jax.random.split(key)

    params = make_params(k_params)
    state = jax.random.normal(k_state, (BATCH, STATE_SPACE), jnp.float32)

    weights, bias_slab = pack_params(params)
    out = duelling_dqn_forward(state, weights, bias_slab)
    out = jax.block_until_ready(out)

    ref = reference_forward(state, params)
    assert out.shape == (BATCH, ACTION_SPACE)
    assert jnp.allclose(out, ref, atol=1e-3, rtol=1e-3), "mismatch vs JAX reference"

    print("KERNEL_OK")
</pallas_src>

<mosaic_0001>
module attributes {stable_mosaic.version = 11 : i64} {
  func.func @_duelling_kernel(%arg0: memref<8x16xf32, #tpu.memory_space<vmem>>, %arg1: memref<16x500xbf16, #tpu.memory_space<vmem>>, %arg2: memref<500x500xbf16, #tpu.memory_space<vmem>>, %arg3: memref<500x300xbf16, #tpu.memory_space<vmem>>, %arg4: memref<300x200xbf16, #tpu.memory_space<vmem>>, %arg5: memref<200x10xbf16, #tpu.memory_space<vmem>>, %arg6: memref<10x5xbf16, #tpu.memory_space<vmem>>, %arg7: memref<8x512xf32, #tpu.memory_space<vmem>>, %arg8: memref<8x4xf32, #tpu.memory_space<vmem>>) attributes {dimension_semantics = [], scalar_prefetch = 0 : i64, scratch_operands = 0 : i64, tpu.core_type = #tpu.core_type<tc>} {
    %c0 = arith.constant 0 : index
    %c0_0 = arith.constant 0 : index
    %0 = vector.load %arg0[%c0, %c0_0] : memref<8x16xf32, #tpu.memory_space<vmem>>, vector<8x16xf32>
    %1 = arith.truncf %0 : vector<8x16xf32> to vector<8x16xbf16>
    %c0_1 = arith.constant 0 : index
    %c0_2 = arith.constant 0 : index
    %2 = vector.load %arg1[%c0_1, %c0_2] : memref<16x500xbf16, #tpu.memory_space<vmem>>, vector<16x500xbf16>
    %cst = arith.constant dense<0.000000e+00> : vector<8x500xf32>
    %3 = tpu.matmul %1, %2, %cst {dimension_numbers = #tpu.dot_dimension_numbers<[1], [0], [0], [1], [0, 0, 1, 1], [], []>} : vector<8x16xbf16>, vector<16x500xbf16>, vector<8x500xf32> -> vector<8x500xf32>
    %c0_3 = arith.constant 0 : index
    %c0_4 = arith.constant 0 : index
    %4 = vector.load %arg7[%c0_3, %c0_4] : memref<8x512xf32, #tpu.memory_space<vmem>>, vector<1x500xf32>
    %5 = vector.broadcast %4 : vector<1x500xf32> to vector<8x500xf32>
    %6 = arith.addf %3, %5 : vector<8x500xf32>
    %cst_5 = arith.constant 0.000000e+00 : f32
    %7 = vector.broadcast %cst_5 : f32 to vector<8x500xf32>
    %8 = arith.maximumf %6, %7 : vector<8x500xf32>
    %9 = arith.truncf %8 : vector<8x500xf32> to vector<8x500xbf16>
    %c0_6 = arith.constant 0 : index
    %c0_7 = arith.constant 0 : index
    %10 = vector.load %arg2[%c0_6, %c0_7] : memref<500x500xbf16, #tpu.memory_space<vmem>>, vector<500x500xbf16>
    %cst_8 = arith.constant dense<0.000000e+00> : vector<8x500xf32>
    %11 = tpu.matmul %9, %10, %cst_8 {dimension_numbers = #tpu.dot_dimension_numbers<[1], [0], [0], [1], [0, 0, 1, 1], [], []>} : vector<8x500xbf16>, vector<500x500xbf16>, vector<8x500xf32> -> vector<8x500xf32>
    %c1 = arith.constant 1 : index
    %c0_9 = arith.constant 0 : index
    %12 = vector.load %arg7[%c1, %c0_9] : memref<8x512xf32, #tpu.memory_space<vmem>>, vector<1x500xf32>
    %13 = vector.broadcast %12 : vector<1x500xf32> to vector<8x500xf32>
    %14 = arith.addf %11, %13 : vector<8x500xf32>
    %cst_10 = arith.constant 0.000000e+00 : f32
    %15 = vector.broadcast %cst_10 : f32 to vector<8x500xf32>
    %16 = arith.maximumf %14, %15 : vector<8x500xf32>
    %17 = arith.truncf %16 : vector<8x500xf32> to vector<8x500xbf16>
    %c0_11 = arith.constant 0 : index
    %c0_12 = arith.constant 0 : index
    %18 = vector.load %arg3[%c0_11, %c0_12] : memref<500x300xbf16, #tpu.memory_space<vmem>>, vector<500x300xbf16>
    %cst_13 = arith.constant dense<0.000000e+00> : vector<8x300xf32>
    %19 = tpu.matmul %17, %18, %cst_13 {dimension_numbers = #tpu.dot_dimension_numbers<[1], [0], [0], [1], [0, 0, 1, 1], [], []>} : vector<8x500xbf16>, vector<500x300xbf16>, vector<8x300xf32> -> vector<8x300xf32>
    %c2 = arith.constant 2 : index
    %c0_14 = arith.constant 0 : index
    %20 = vector.load %arg7[%c2, %c0_14] : memref<8x512xf32, #tpu.memory_space<vmem>>, vector<1x300xf32>
    %21 = vector.broadcast %20 : vector<1x300xf32> to vector<8x300xf32>
    %22 = arith.addf %19, %21 : vector<8x300xf32>
    %cst_15 = arith.constant 0.000000e+00 : f32
    %23 = vector.broadcast %cst_15 : f32 to vector<8x300xf32>
    %24 = arith.maximumf %22, %23 : vector<8x300xf32>
    %25 = arith.truncf %24 : vector<8x300xf32> to vector<8x300xbf16>
    %c0_16 = arith.constant 0 : index
    %c0_17 = arith.constant 0 : index
    %26 = vector.load %arg4[%c0_16, %c0_17] : memref<300x200xbf16, #tpu.memory_space<vmem>>, vector<300x200xbf16>
    %cst_18 = arith.constant dense<0.000000e+00> : vector<8x200xf32>
    %27 = tpu.matmul %25, %26, %cst_18 {dimension_numbers = #tpu.dot_dimension_numbers<[1], [0], [0], [1], [0, 0, 1, 1], [], []>} : vector<8x300xbf16>, vector<300x200xbf16>, vector<8x200xf32> -> vector<8x200xf32>
    %c3 = arith.constant 3 : index
    %c0_19 = arith.constant 0 : index
    %28 = vector.load %arg7[%c3, %c0_19] : memref<8x512xf32, #tpu.memory_space<vmem>>, vector<1x200xf32>
    %29 = vector.broadcast %28 : vector<1x200xf32> to vector<8x200xf32>
    %30 = arith.addf %27, %29 : vector<8x200xf32>
    %cst_20 = arith.constant 0.000000e+00 : f32
    %31 = vector.broadcast %cst_20 : f32 to vector<8x200xf32>
    %32 = arith.maximumf %30, %31 : vector<8x200xf32>
    %33 = arith.truncf %32 : vector<8x200xf32> to vector<8x200xbf16>
    %c0_21 = arith.constant 0 : index
    %c0_22 = arith.constant 0 : index
    %34 = vector.load %arg5[%c0_21, %c0_22] : memref<200x10xbf16, #tpu.memory_space<vmem>>, vector<200x10xbf16>
    %cst_23 = arith.constant dense<0.000000e+00> : vector<8x10xf32>
    %35 = tpu.matmul %33, %34, %cst_23 {dimension_numbers = #tpu.dot_dimension_numbers<[1], [0], [0], [1], [0, 0, 1, 1], [], []>} : vector<8x200xbf16>, vector<200x10xbf16>, vector<8x10xf32> -> vector<8x10xf32>
    %c4 = arith.constant 4 : index
    %c0_24 = arith.constant 0 : index
    %36 = vector.load %arg7[%c4, %c0_24] : memref<8x512xf32, #tpu.memory_space<vmem>>, vector<1x10xf32>
    %37 = vector.broadcast %36 : vector<1x10xf32> to vector<8x10xf32>
    %38 = arith.addf %35, %37 : vector<8x10xf32>
    %cst_25 = arith.constant 0.000000e+00 : f32
    %39 = vector.broadcast %cst_25 : f32 to vector<8x10xf32>
    %40 = arith.maximumf %38, %39 : vector<8x10xf32>
    %41 = arith.truncf %40 : vector<8x10xf32> to vector<8x10xbf16>
    %c0_26 = arith.constant 0 : index
    %c0_27 = arith.constant 0 : index
    %42 = vector.load %arg6[%c0_26, %c0_27] : memref<10x5xbf16, #tpu.memory_space<vmem>>, vector<10x5xbf16>
    %cst_28 = arith.constant dense<0.000000e+00> : vector<8x5xf32>
    %43 = tpu.matmul %41, %42, %cst_28 {dimension_numbers = #tpu.dot_dimension_numbers<[1], [0], [0], [1], [0, 0, 1, 1], [], []>} : vector<8x10xbf16>, vector<10x5xbf16>, vector<8x5xf32> -> vector<8x5xf32>
    %c5 = arith.constant 5 : index
    %c0_29 = arith.constant 0 : index
    %44 = vector.load %arg7[%c5, %c0_29] : memref<8x512xf32, #tpu.memory_space<vmem>>, vector<1x5xf32>
    %45 = vector.broadcast %44 : vector<1x5xf32> to vector<8x5xf32>
    %46 = arith.addf %43, %45 : vector<8x5xf32>
    %cst_30 = arith.constant 0.000000e+00 : f32
    %47 = vector.broadcast %cst_30 : f32 to vector<8x5xf32>
    %48 = arith.maximumf %46, %47 : vector<8x5xf32>
    %49 = vector.extract_strided_slice %48 {offsets = [0, 0], sizes = [8, 1], strides = [1, 1]} : vector<8x5xf32> to vector<8x1xf32>
    %50 = vector.extract_strided_slice %48 {offsets = [0, 1], sizes = [8, 4], strides = [1, 1]} : vector<8x5xf32> to vector<8x4xf32>
    %51 = vector.broadcast %49 : vector<8x1xf32> to vector<8x4xf32>
    %52 = arith.addf %51, %50 : vector<8x4xf32>
    %53 = vector.shape_cast %50 : vector<8x4xf32> to vector<1x8x4xf32>
    %cst_31 = arith.constant dense<0.000000e+00> : vector<1xf32>
    %54 = vector.multi_reduction <add>, %53, %cst_31 [1, 2] : vector<1x8x4xf32> to vector<1xf32>
    %55 = vector.shape_cast %54 : vector<1xf32> to vector<1x1x1xf32>
    %56 = vector.extract %55[0, 0, 0] : f32 from vector<1x1x1xf32>
    %cst_32 = arith.constant 3.200000e+01 : f32
    %57 = arith.divf %56, %cst_32 : f32
    %58 = vector.broadcast %57 : f32 to vector<8x4xf32>
    %59 = arith.subf %52, %58 : vector<8x4xf32>
    %c0_33 = arith.constant 0 : index
    %c0_34 = arith.constant 0 : index
    %60 = vector.load %arg8[%c0_33, %c0_34] : memref<8x4xf32, #tpu.memory_space<vmem>>, vector<8x4xf32>
    tpu.vector_store %arg8[%c0_33, %c0_34], %59 {strides = array<i32>} : memref<8x4xf32, #tpu.memory_space<vmem>>, vector<8x4xf32>,
    return
  }
}

</mosaic_0001>

<bundles_post_ra>
// kernel: duelling_dqn_forward.1
= control target key start
LH: loop header
LB: loop body
LE: loop exit
PB: predicated region body
PF: predicated region fallthrough
CT: control target
= control target key end

     0   :  { %v3321_v1 = vmov 0   ;;  %vm78_vm0 = vcmask 130048   ;;  %vm951_vm1 = vcmask 949248   ;;  %vm955_vm2 = vcmask 1041408   ;;  %s3324_s23 = smov 127   ;;  %s4303_s1 = inlined_call_operand.vmem [shape: bf16[16,500], index: 1, kind: input, shape index: {}]   ;;  %s4304_s0 = inlined_call_operand.vmem [shape: f32[8,16], index: 0, kind: input, shape index: {}]   ;;  %s4305_s2 = inlined_call_operand.vmem [shape: bf16[500,500], index: 2, kind: input, shape index: {}]   ;;  %s4306_s3 = inlined_call_operand.vmem [shape: bf16[500,300], index: 3, kind: input, shape index: {}]   ;;  %s4307_s7 = inlined_call_operand.vmem [shape: f32[8,512], index: 7, kind: input, shape index: {}]   ;;  %s4308_s4 = inlined_call_operand.vmem [shape: bf16[300,200], index: 4, kind: input, shape index: {}]   ;;  %s4309_s5 = inlined_call_operand.vmem [shape: bf16[200,10], index: 5, kind: input, shape index: {}]   ;;  %s4310_s6 = inlined_call_operand.vmem [shape: bf16[10,5], index: 6, kind: input, shape index: {}]   ;;  %s4311_s8 = inlined_call_operand.vmem [shape: f32[8,4], index: 8, kind: output, shape index: {}]  }
   0x1   :  { %v2927_v0 = vld [vmem:[%s4303_s1 + $0x4] ss:$16 sps:$4 sm:$0xff]   ;;  %114 = vmatprep.mubr.bf16.mxu1 %v3321_v1  ;;  %2925 = vset.pattern.permute.xlu1 %v3321_v1  ;;  %v2929_v2 = vld [vmem:[%s4303_s1] ss:$16 sps:$4 sm:$0xff]   ;;  %v2930_v5 = vld [vmem:[%s4303_s1 + $0x8] ss:$16 sps:$4 sm:$0xff]  }
   0x2   :  { %v30_v3 = vld [vmem:[%s4304_s0] sm:$0xff]  ;;  %2926 = vset.pattern.permute.xlu0 %v3321_v1  ;;  %82 = vmatprep.subr.bf16.mxu1 %v2927_v0  ;;  %v2932_v6 = vld [vmem:[%s4303_s1 + $0xc] ss:$16 sps:$4 sm:$0xff]   ;;  %v2935_v13 = vld [vmem:[%s4305_s2 + $0x8] ss:$16 sps:$4 sm:$0xff]   ;;  %vm2211_vm3 = vcmask 1045504  }
   0x3   :  { %v31_v4 = vpack.c.bf16 %v30_v3, %v30_v3  ;;  %83 = vmatpush1.bf16.msra.mxu1 %v2929_v2  ;;  %v2933_v7 = vld [vmem:[%s4305_s2 + $0x4] ss:$16 sps:$4 sm:$0xff]   ;;  %v2937_v8 = vld [vmem:[%s4305_s2 + $0xc] ss:$16 sps:$4 sm:$0xff]   ;;  %v2938_v9 = vld [vmem:[%s4305_s2] ss:$16 sps:$4 sm:$0xff]  }
   0x4   :  { %123 = vmatprep.subr.bf16.mxu1 %v2932_v6  ;;  %968 = vmatprep.subr.bf16.mxu0 %v2933_v7  ;;  %v2939_v10 = vld [vmem:[%s4305_s2 + $0x24] ss:$16 sps:$4 sm:$0xff]   ;;  %v2944_v11 = vld [vmem:[%s4305_s2 + $0x20] ss:$16 sps:$4 sm:$0xff]   ;;  %v2943_v14 = vld [vmem:[%s4305_s2 + $0x2c] ss:$16 sps:$4 sm:$0xff]  }
   0x5   :  { %969 = vmatpush1.bf16.msra.mxu0 %v2938_v9  ;;  %v2945_v12 = vld [vmem:[%s4305_s2 + $0x44] ss:$16 sps:$4 sm:$0xff]   ;;  %v2950_v15 = vld [vmem:[%s4305_s2 + $0x40] ss:$16 sps:$4 sm:$0xff]   ;;  %v2941_v17 = vld [vmem:[%s4305_s2 + $0x28] ss:$16 sps:$4 sm:$0xff]  }
   0x6   :  { %2550 = vmatmul.mubr.msk.bf16.vlgmr.msra.gmra.mrb[0].mxu1 %vm78_vm0, %v31_v4  ;;  %970 = vmatprep.subr.bf16.mxu0 %v2939_v10  ;;  %v2951_v16 = vld [vmem:[%s4305_s2 + $0x64] ss:$16 sps:$4 sm:$0xff]   ;;  %v2949_v18 = vld [vmem:[%s4305_s2 + $0x4c] ss:$16 sps:$4 sm:$0xff]   ;;  %v2956_v19 = vld [vmem:[%s4305_s2 + $0x60] ss:$16 sps:$4 sm:$0xff]   ;;  %v38_v10 = vlaneseq }
   0x7   :  { %124 = vmatpush1.bf16.msra.mxu1 %v2930_v5  ;;  %155 = vmatprep.mubr.bf16.mxu1 %v3321_v1  ;;  %v2957_v20 = vld [vmem:[%s4305_s2 + $0x84] ss:$16 sps:$4 sm:$0xff]   ;;  %v2947_v21 = vld [vmem:[%s4305_s2 + $0x48] ss:$16 sps:$4 sm:$0xff]   ;;  %v2955_v22 = vld [vmem:[%s4305_s2 + $0x6c] ss:$16 sps:$4 sm:$0xff]  }
   0x8   :  { %1050 = vmatprep.subr.bf16.mxu1 %v2937_v8  ;;  %v2962_v23 = vld [vmem:[%s4305_s2 + $0x80] ss:$16 sps:$4 sm:$0xff]   ;;  %v2963_v24 = vld [vmem:[%s4305_s2 + $0xa4] ss:$16 sps:$4 sm:$0xff]   ;;  %v2953_v25 = vld [vmem:[%s4305_s2 + $0x68] ss:$16 sps:$4 sm:$0xff]  }
   0x9   :  { %971 = vmatpush1.bf16.msra.mxu0 %v2944_v11  ;;  %v2961_v26 = vld [vmem:[%s4305_s2 + $0x8c] ss:$16 sps:$4 sm:$0xff]   ;;  %v2968_v27 = vld [vmem:[%s4305_s2 + $0xa0] ss:$16 sps:$4 sm:$0xff]   ;;  %v2969_v28 = vld [vmem:[%s4305_s2 + $0xc4] ss:$16 sps:$4 sm:$0xff]  }
   0xa   :  { %972 = vmatprep.subr.bf16.mxu0 %v2945_v12  ;;  %v2959_v29 = vld [vmem:[%s4305_s2 + $0x88] ss:$16 sps:$4 sm:$0xff]   ;;  %v2967_v30 = vld [vmem:[%s4305_s2 + $0xac] ss:$16 sps:$4 sm:$0xff]   ;;  %v2974_v31 = vld [vmem:[%s4305_s2 + $0xc0] ss:$16 sps:$4 sm:$0xff]  }
   0xb   :  { %v2975_v32 = vld [vmem:[%s4305_s2 + $0xe4] ss:$16 sps:$4 sm:$0xff]   ;;  %v2965_v33 = vld [vmem:[%s4305_s2 + $0xa8] ss:$16 sps:$4 sm:$0xff]   ;;  %v2973_v34 = vld [vmem:[%s4305_s2 + $0xcc] ss:$16 sps:$4 sm:$0xff]  }
   0xc   :  { %v2980_v35 = vld [vmem:[%s4305_s2 + $0xe0] ss:$16 sps:$4 sm:$0xff]   ;;  %v2981_v36 = vld [vmem:[%s4305_s2 + $0x104] ss:$16 sps:$4 sm:$0xff]   ;;  %v2971_v37 = vld [vmem:[%s4305_s2 + $0xc8] ss:$16 sps:$4 sm:$0xff]  }
   0xd   :  { %973 = vmatpush1.bf16.msra.mxu0 %v2950_v15  ;;  %v2979_v38 = vld [vmem:[%s4305_s2 + $0xec] ss:$16 sps:$4 sm:$0xff]   ;;  %v2986_v39 = vld [vmem:[%s4305_s2 + $0x100] ss:$16 sps:$4 sm:$0xff]   ;;  %v2987_v40 = vld [vmem:[%s4305_s2 + $0x124] ss:$16 sps:$4 sm:$0xff]  }
   0xe   :  { %2551 = vmatmul.mubr.msk.bf16.vlgmr.msra.gmra.mrb[4].mxu1 %vm78_vm0, %v31_v4  ;;  %974 = vmatprep.subr.bf16.mxu0 %v2951_v16  ;;  %v2977_v41 = vld [vmem:[%s4305_s2 + $0xe8] ss:$16 sps:$4 sm:$0xff]   ;;  %v2985_v42 = vld [vmem:[%s4305_s2 + $0x10c] ss:$16 sps:$4 sm:$0xff]   ;;  %v2992_v43 = vld [vmem:[%s4305_s2 + $0x120] ss:$16 sps:$4 sm:$0xff]  }
   0xf   :  { %1051 = vmatpush1.bf16.msra.mxu1 %v2935_v13  ;;  %v2993_v44 = vld [vmem:[%s4305_s2 + $0x144] ss:$16 sps:$4 sm:$0xff]   ;;  %v2983_v45 = vld [vmem:[%s4305_s2 + $0x108] ss:$16 sps:$4 sm:$0xff]   ;;  %v2991_v46 = vld [vmem:[%s4305_s2 + $0x12c] ss:$16 sps:$4 sm:$0xff]  }
  0x10   :  { %1052 = vmatprep.subr.bf16.mxu1 %v2943_v14  ;;  %v2998_v47 = vld [vmem:[%s4305_s2 + $0x140] ss:$16 sps:$4 sm:$0xff]   ;;  %v2999_v48 = vld [vmem:[%s4305_s2 + $0x164] ss:$16 sps:$4 sm:$0xff]   ;;  %v2989_v49 = vld [vmem:[%s4305_s2 + $0x128] ss:$16 sps:$4 sm:$0xff]  }
  0x11   :  { %975 = vmatpush1.bf16.msra.mxu0 %v2956_v19  ;;  %v2997_v50 = vld [vmem:[%s4305_s2 + $0x14c] ss:$16 sps:$4 sm:$0xff]   ;;  %v3004_v51 = vld [vmem:[%s4305_s2 + $0x160] ss:$16 sps:$4 sm:$0xff]   ;;  %v3005_v52 = vld [vmem:[%s4305_s2 + $0x184] ss:$16 sps:$4 sm:$0xff]  }
  0x12   :  { %976 = vmatprep.subr.bf16.mxu0 %v2957_v20  ;;  %v2995_v53 = vld [vmem:[%s4305_s2 + $0x148] ss:$16 sps:$4 sm:$0xff]   ;;  %v3003_v54 = vld [vmem:[%s4305_s2 + $0x16c] ss:$16 sps:$4 sm:$0xff]   ;;  %v3010_v55 = vld [vmem:[%s4305_s2 + $0x180] ss:$16 sps:$4 sm:$0xff]  }
  0x13   :  { %1053 = vmatpush1.bf16.msra.mxu1 %v2941_v17  ;;  %v3011_v56 = vld [vmem:[%s4305_s2 + $0x1a4] ss:$16 sps:$4 sm:$0xff]   ;;  %v3001_v57 = vld [vmem:[%s4305_s2 + $0x168] ss:$16 sps:$4 sm:$0xff]   ;;  %v3009_v58 = vld [vmem:[%s4305_s2 + $0x18c] ss:$16 sps:$4 sm:$0xff]  }
  0x14   :  { %1054 = vmatprep.subr.bf16.mxu1 %v2949_v18  ;;  %v3016_v59 = vld [vmem:[%s4305_s2 + $0x1a0] ss:$16 sps:$4 sm:$0xff]   ;;  %v3007_v60 = vld [vmem:[%s4305_s2 + $0x188] ss:$16 sps:$4 sm:$0xff]   ;;  %v3015_v61 = vld [vmem:[%s4305_s2 + $0x1ac] ss:$16 sps:$4 sm:$0xff]  }
  0x15   :  { %977 = vmatpush1.bf16.msra.mxu0 %v2962_v23  ;;  %v3013_v62 = vld [vmem:[%s4305_s2 + $0x1a8] ss:$16 sps:$4 sm:$0xff]   ;;  %v3017_v63 = vld [vmem:[%s4305_s2 + $0x1c4] ss:$16 sps:$4 sm:$0xff]   ;;  %v3021_v0 = vld [vmem:[%s4305_s2 + $0x1cc] ss:$16 sps:$4 sm:$0xff]  }
  0x16   :  { %978 = vmatprep.subr.bf16.mxu0 %v2963_v24  ;;  %v3019_v2 = vld [vmem:[%s4305_s2 + $0x1c8] ss:$16 sps:$4 sm:$0xff]   ;;  %v3022_v3 = vld [vmem:[%s4305_s2 + $0x1c0] ss:$16 sps:$4 sm:$0xff]   ;;  %v3023_v4 = vld [vmem:[%s4305_s2 + $0x1e4] ss:$16 sps:$4 sm:$0xff]  }
  0x17   :  { %1055 = vmatpush1.bf16.msra.mxu1 %v2947_v21  ;;  %v3027_v5 = vld [vmem:[%s4305_s2 + $0x1ec] ss:$16 sps:$4 sm:$0xff]   ;;  %v3025_v6 = vld [vmem:[%s4305_s2 + $0x1e8] ss:$16 sps:$4 sm:$0xff]   ;;  %v3028_v7 = vld [vmem:[%s4305_s2 + $0x1e0] ss:$16 sps:$4 sm:$0xff]  }
  0x18   :  { %1056 = vmatprep.subr.bf16.mxu1 %v2955_v22  ;;  %v3031_v8 = vld [vmem:[%s4305_s2 + $0x204] ss:$16 sps:$4 sm:$0xff]   ;;  %v3034_v9 = vld [vmem:[%s4305_s2 + $0x20c] ss:$16 sps:$4 sm:$0xff]   ;;  %v3589_v11 = vshrl.u32 %v38_v10, 7  ;;  %vm2207_vm4 = vcmask 359424  }
  0x19   :  { %979 = vmatpush1.bf16.msra.mxu0 %v2968_v27  ;;  %v3597_v13 = vld [vmem:[%s4307_s7] ss:$8 sm:$0xf]  ;;  %vm2409_vm5 = vcmask 1043456   ;;  %vm2467_vm6 = vcmask 1044480   ;;  %vm2405_vm7 = vcmask 588800  }
  0x1a   :  { %980 = vmatprep.subr.bf16.mxu0 %v2969_v28  ;;  %v3592_v12 = vsub.s32 0, %v3589_v11  ;;  %v3600_v14 = vsub.s32 1, %v3589_v11  ;;  %v52_v22 = vsub.s32 3, %v3589_v11  ;;  %v3029_v27 = vld [vmem:[%s4305_s2 + $0x200] ss:$16 sps:$4 sm:$0xff]   ;;  %vm3323_vm8 = vmmov 0  }
  0x1b   :  { %1057 = vmatpush1.bf16.msra.mxu1 %v2953_v25  ;;  %v3032_v28 = vld [vmem:[%s4305_s2 + $0x208] ss:$16 sps:$4 sm:$0xff]   ;;  %vm2463_vm9 = vcmask 80896   ;;  %vm2521_vm10 = vcmask 31744  }
  0x1c   :  { %1058 = vmatprep.subr.bf16.mxu1 %v2961_v26  ;;  %v41_v15 = vrot.slane %v3597_v13, %v3592_v12  ;;  %v45_v16 = vrot.slane %v3597_v13, %v3600_v14  ;;  %v3086_v10 = vld [vmem:[%s4305_s2 + $0x328] ss:$16 sps:$4 sm:$0xff]  }
  0x1d   :  { %981 = vmatpush1.bf16.msra.mxu0 %v2974_v31  ;;  %v3037_v31 = vld [vmem:[%s4305_s2 + $0x224] ss:$16 sps:$4 sm:$0xff]  }
  0x1e   :  { %982 = vmatprep.subr.bf16.mxu0 %v2975_v32  ;;  %v3040_v32 = vld [vmem:[%s4305_s2 + $0x22c] ss:$16 sps:$4 sm:$0xff]  }
  0x1f   :  { %1059 = vmatpush1.bf16.msra.mxu1 %v2959_v29  ;;  %v53_v29 = vrot.slane %v3597_v13, %v52_v22 }
  0x20   :  { %1060 = vmatprep.subr.bf16.mxu1 %v2967_v30 }
  0x21   :  { %983 = vmatpush1.bf16.msra.mxu0 %v2980_v35  ;;  %v3035_v35 = vld [vmem:[%s4305_s2 + $0x220] ss:$16 sps:$4 sm:$0xff]  }
  0x22   :  { %984 = vmatprep.subr.bf16.mxu0 %v2981_v36  ;;  %v3038_v36 = vld [vmem:[%s4305_s2 + $0x228] ss:$16 sps:$4 sm:$0xff]  }
  0x23   :  { %1061 = vmatpush1.bf16.msra.mxu1 %v2965_v33 }
  0x24   :  { %1062 = vmatprep.subr.bf16.mxu1 %v2973_v34 }
  0x25   :  { %985 = vmatpush1.bf16.msra.mxu0 %v2986_v39  ;;  %v3043_v39 = vld [vmem:[%s4305_s2 + $0x244] ss:$16 sps:$4 sm:$0xff]  }
  0x26   :  { %986 = vmatprep.subr.bf16.mxu0 %v2987_v40  ;;  %v3046_v40 = vld [vmem:[%s4305_s2 + $0x24c] ss:$16 sps:$4 sm:$0xff]  }
  0x27   :  { %1063 = vmatpush1.bf16.msra.mxu1 %v2971_v37 }
  0x28   :  { %1064 = vmatprep.subr.bf16.mxu1 %v2979_v38 }
  0x29   :  { %987 = vmatpush1.bf16.msra.mxu0 %v2992_v43  ;;  %v3041_v43 = vld [vmem:[%s4305_s2 + $0x240] ss:$16 sps:$4 sm:$0xff]  }
  0x2a   :  { %988 = vmatprep.subr.bf16.mxu0 %v2993_v44  ;;  %v3044_v44 = vld [vmem:[%s4305_s2 + $0x248] ss:$16 sps:$4 sm:$0xff]  }
  0x2b   :  { %1065 = vmatpush1.bf16.msra.mxu1 %v2977_v41 }
  0x2c   :  { %1066 = vmatprep.subr.bf16.mxu1 %v2985_v42 }
  0x2d   :  { %989 = vmatpush1.bf16.msra.mxu0 %v2998_v47  ;;  %v3052_v47 = vld [vmem:[%s4305_s2 + $0x26c] ss:$16 sps:$4 sm:$0xff]  }
  0x2e   :  { %990 = vmatprep.subr.bf16.mxu0 %v2999_v48  ;;  %v3047_v48 = vld [vmem:[%s4305_s2 + $0x260] ss:$16 sps:$4 sm:$0xff]  }
  0x2f   :  { %1067 = vmatpush1.bf16.msra.mxu1 %v2983_v45 }
  0x30   :  { %1068 = vmatprep.subr.bf16.mxu1 %v2991_v46  ;;  %v3049_v46 = vld [vmem:[%s4305_s2 + $0x264] ss:$16 sps:$4 sm:$0xff]  }
  0x31   :  { %991 = vmatpush1.bf16.msra.mxu0 %v3004_v51  ;;  %v3058_v51 = vld [vmem:[%s4305_s2 + $0x28c] ss:$16 sps:$4 sm:$0xff]  }
  0x32   :  { %992 = vmatprep.subr.bf16.mxu0 %v3005_v52  ;;  %v3053_v52 = vld [vmem:[%s4305_s2 + $0x280] ss:$16 sps:$4 sm:$0xff]  }
  0x33   :  { %1069 = vmatpush1.bf16.msra.mxu1 %v2989_v49  ;;  %v3050_v49 = vld [vmem:[%s4305_s2 + $0x268] ss:$16 sps:$4 sm:$0xff]  }
  0x34   :  { %1070 = vmatprep.subr.bf16.mxu1 %v2997_v50  ;;  %v3055_v50 = vld [vmem:[%s4305_s2 + $0x284] ss:$16 sps:$4 sm:$0xff]  }
  0x35   :  { %993 = vmatpush1.bf16.msra.mxu0 %v3010_v55  ;;  %v3064_v55 = vld [vmem:[%s4305_s2 + $0x2ac] ss:$16 sps:$4 sm:$0xff]  }
  0x36   :  { %994 = vmatprep.subr.bf16.mxu0 %v3011_v56  ;;  %v3059_v56 = vld [vmem:[%s4305_s2 + $0x2a0] ss:$16 sps:$4 sm:$0xff]  }
  0x37   :  { %1071 = vmatpush1.bf16.msra.mxu1 %v2995_v53  ;;  %v3056_v53 = vld [vmem:[%s4305_s2 + $0x288] ss:$16 sps:$4 sm:$0xff]  }
  0x38   :  { %1072 = vmatprep.subr.bf16.mxu1 %v3003_v54  ;;  %v3061_v54 = vld [vmem:[%s4305_s2 + $0x2a4] ss:$16 sps:$4 sm:$0xff]  }
  0x39   :  { %995 = vmatpush1.bf16.msra.mxu0 %v3016_v59  ;;  %v3070_v59 = vld [vmem:[%s4305_s2 + $0x2cc] ss:$16 sps:$4 sm:$0xff]  }
  0x3a   :  { %996 = vmatprep.subr.bf16.mxu0 %v3017_v63  ;;  %v3076_v63 = vld [vmem:[%s4305_s2 + $0x2ec] ss:$16 sps:$4 sm:$0xff]  }
  0x3b   :  { %1073 = vmatpush1.bf16.msra.mxu1 %v3001_v57  ;;  %v3062_v57 = vld [vmem:[%s4305_s2 + $0x2a8] ss:$16 sps:$4 sm:$0xff]  }
  0x3c   :  { %1074 = vmatprep.subr.bf16.mxu1 %v3009_v58  ;;  %v3067_v58 = vld [vmem:[%s4305_s2 + $0x2c4] ss:$16 sps:$4 sm:$0xff]  }
  0x3d   :  { %997 = vmatpush1.bf16.msra.mxu0 %v3022_v3  ;;  %v3079_v3 = vld [vmem:[%s4305_s2 + $0x304] ss:$16 sps:$4 sm:$0xff]  }
  0x3e   :  { %998 = vmatprep.subr.bf16.mxu0 %v3023_v4  ;;  %v3082_v4 = vld [vmem:[%s4305_s2 + $0x30c] ss:$16 sps:$4 sm:$0xff]  }
  0x3f   :  { %1075 = vmatpush1.bf16.msra.mxu1 %v3007_v60  ;;  %v3065_v60 = vld [vmem:[%s4305_s2 + $0x2c0] ss:$16 sps:$4 sm:$0xff]  }
  0x40   :  { %1076 = vmatprep.subr.bf16.mxu1 %v3015_v61  ;;  %v3068_v61 = vld [vmem:[%s4305_s2 + $0x2c8] ss:$16 sps:$4 sm:$0xff]  }
  0x41   :  { %999 = vmatpush1.bf16.msra.mxu0 %v3028_v7  ;;  %v3085_v7 = vld [vmem:[%s4305_s2 + $0x324] ss:$16 sps:$4 sm:$0xff]  }
  0x42   :  { %1009 = vmatprep.subr.bf16.mxu0 %v3031_v8  ;;  %v3088_v8 = vld [vmem:[%s4305_s2 + $0x32c] ss:$16 sps:$4 sm:$0xff]  }
  0x43   :  { %1077 = vmatpush1.bf16.msra.mxu1 %v3013_v62  ;;  %v3073_v62 = vld [vmem:[%s4305_s2 + $0x2e4] ss:$16 sps:$4 sm:$0xff]  }
  0x44   :  { %1078 = vmatprep.subr.bf16.mxu1 %v3021_v0  ;;  %v3071_v0 = vld [vmem:[%s4305_s2 + $0x2e0] ss:$16 sps:$4 sm:$0xff]  }
  0x47   :  { %1079 = vmatpush1.bf16.msra.mxu1 %v3019_v2  ;;  %v3074_v2 = vld [vmem:[%s4305_s2 + $0x2e8] ss:$16 sps:$4 sm:$0xff]  }
  0x48   :  { %1080 = vmatprep.subr.bf16.mxu1 %v3027_v5  ;;  %v3077_v5 = vld [vmem:[%s4305_s2 + $0x300] ss:$16 sps:$4 sm:$0xff]  }
  0x4b   :  { %1081 = vmatpush1.bf16.msra.mxu1 %v3025_v6  ;;  %v3080_v6 = vld [vmem:[%s4305_s2 + $0x308] ss:$16 sps:$4 sm:$0xff]  }
  0x4c   :  { %1091 = vmatprep.subr.bf16.mxu1 %v3034_v9  ;;  %v3083_v9 = vld [vmem:[%s4305_s2 + $0x320] ss:$16 sps:$4 sm:$0xff]  }
  0xd9   :  { %v116_v17 = vpop.f32.mrb[0].mxu1 }
  0xda   :  { %v117_v18 = vadd.f32 %v116_v17, %v41_v15  ;;  %v118_v19 = vpop.f32.mrb[1].mxu1  ;;  %v3091_v15 = vld [vmem:[%s4305_s2 + $0x344] ss:$16 sps:$4 sm:$0xff]   ;;  %v3089_v17 = vld [vmem:[%s4305_s2 + $0x340] ss:$16 sps:$4 sm:$0xff]  }
  0xdb   :  { %v119_v20 = vadd.f32 %v118_v19, %v45_v16  ;;  %v120_v21 = vpop.f32.mrb[2].mxu1  ;;  %v3094_v16 = vld [vmem:[%s4305_s2 + $0x34c] ss:$16 sps:$4 sm:$0xff]   ;;  %v3097_v19 = vld [vmem:[%s4305_s2 + $0x364] ss:$16 sps:$4 sm:$0xff]  }
  0xdc   :  { %v164_v23 = vmax.f32 %v117_v18, 0.0  ;;  %v121_v24 = vpop.f32.mrb[3].mxu1  ;;  %v3092_v18 = vld [vmem:[%s4305_s2 + $0x348] ss:$16 sps:$4 sm:$0xff]   ;;  %v3095_v21 = vld [vmem:[%s4305_s2 + $0x360] ss:$16 sps:$4 sm:$0xff]  }
  0xdd   :  { %v165_v25 = vmax.f32 %v119_v20, 0.0  ;;  %v3100_v20 = vld [vmem:[%s4305_s2 + $0x36c] ss:$16 sps:$4 sm:$0xff]   ;;  %v3103_v24 = vld [vmem:[%s4305_s2 + $0x384] ss:$16 sps:$4 sm:$0xff]  }
  0xde   :  { %v168_v30 = vpack.c.bf16 %v164_v23, %v164_v23  ;;  %v3098_v23 = vld [vmem:[%s4305_s2 + $0x368] ss:$16 sps:$4 sm:$0xff]  }
  0xdf   :  { %v169_v26 = vpack.c.bf16 %v165_v25, %v165_v25  ;;  %v3106_v25 = vld [vmem:[%s4305_s2 + $0x38c] ss:$16 sps:$4 sm:$0xff]  }
  0xe1   :  { %1000 = vmatprep.mubr.bf16.mxu0 %v169_v26  ;;  %1082 = vmatprep.mubr.bf16.mxu1 %v169_v26  ;;  %v3622_v33 = vpop.f32.mrb[4].mxu1  ;;  %v3101_v26 = vld [vmem:[%s4305_s2 + $0x380] ss:$16 sps:$4 sm:$0xff]  }
  0xe2   :  { %1001 = vmatmul.mubr.bf16.vlgmr.msra.gmra.mrb[0].mxu0 %v168_v30  ;;  %1083 = vmatmul.mubr.bf16.vlgmr.msra.gmra.mrb[8].mxu1 %v168_v30  ;;  %v159_v34 = vpop.f32.mrb[5].mxu1  ;;  %v3112_v30 = vld [vmem:[%s4305_s2 + $0x3ac] ss:$16 sps:$4 sm:$0xff]  }
  0xe3   :  { %1010 = vmatpush1.bf16.msra.mxu0 %v3029_v27  ;;  %1092 = vmatpush1.bf16.msra.mxu1 %v3032_v28  ;;  %v160_v37 = vadd.f32 %v159_v34, %v53_v29  ;;  %v161_v38 = vpop.f32.mrb[6].mxu1  ;;  %v3104_v27 = vld [vmem:[%s4305_s2 + $0x388] ss:$16 sps:$4 sm:$0xff]   ;;  %v3765_v28 = vsub.s32 2, %v3589_v11  ;;  %v3109_v29 = vld [vmem:[%s4305_s2 + $0x3a4] ss:$16 sps:$4 sm:$0xff]  }
  0xe4   :  { %1011 = vmatprep.subr.bf16.mxu0 %v3037_v31  ;;  %1093 = vmatprep.subr.bf16.mxu1 %v3040_v32  ;;  %v162_v41 = vpop.f32.mrb[7].mxu1  ;;  %v3107_v31 = vld [vmem:[%s4305_s2 + $0x3a0] ss:$16 sps:$4 sm:$0xff]   ;;  %v3110_v32 = vld [vmem:[%s4305_s2 + $0x3a8] ss:$16 sps:$4 sm:$0xff]  }
  0xe5   :  { %v167_v42 = vmax.f32 %v160_v37, 0.0  ;;  %v49_v34 = vrot.slane %v3597_v13, %v3765_v28  ;;  %v296_v37 = vld [vmem:[%s4305_s2 + $0x3e0] sm:$0x33]  ;;  %v297_v38 = vld [vmem:[%s4305_s2 + $0x3e8] sm:$0x33] }
  0xe6   :  { %v3113_v13 = vld [vmem:[%s4305_s2 + $0x3c0] ss:$16 sps:$4 sm:$0xff]   ;;  %v2677_v41 = vcombine.low %v296_v37, %v296_v37 }
  0xe7   :  { %1012 = vmatpush1.bf16.msra.mxu0 %v3035_v35  ;;  %1094 = vmatpush1.bf16.msra.mxu1 %v3038_v36  ;;  %v171_v45 = vpack.c.bf16 %v167_v42, %v167_v42  ;;  %v3115_v35 = vld [vmem:[%s4305_s2 + $0x3c4] ss:$16 sps:$4 sm:$0xff]   ;;  %v3118_v36 = vld [vmem:[%s4305_s2 + $0x3cc] ss:$16 sps:$4 sm:$0xff]   ;;  %v158_v42 = vadd.f32 %v3622_v33, %v49_v34 }
  0xe8   :  { %1013 = vmatprep.subr.bf16.mxu0 %v3043_v39  ;;  %1095 = vmatprep.subr.bf16.mxu1 %v3046_v40  ;;  %v3116_v39 = vld [vmem:[%s4305_s2 + $0x3c8] ss:$16 sps:$4 sm:$0xff]   ;;  %v2678_v40 = vcombine.high %v296_v37, %v296_v37  ;;  %v3125_v33 = vld [vmem:[%s4306_s3 + $0x4] ss:$12 sps:$4 sm:$0xff]   ;;  %v3187_v11 = vld [vmem:[%s4306_s3 + $0x180] ss:$12 sps:$4 sm:$0xff]  }
  0xe9   :  { %2682 = vmatprep.mubr.msk.bf16.mxu0 %vm951_vm1, %v171_v45  ;;  %2684 = vmatprep.mubr.msk.bf16.mxu1 %vm951_vm1, %v171_v45  ;;  %v957_v45 = vsel %vm955_vm2, %v2677_v41, 0  ;;  %v3177_v34 = vld [vmem:[%s4306_s3 + $0x150] ss:$12 sps:$4 sm:$0xff]  }
  0xea   :  { %v3185_v37 = vld [vmem:[%s4306_s3 + $0x170] ss:$12 sps:$4 sm:$0xff]  }
  0xeb   :  { %1014 = vmatpush1.bf16.msra.mxu0 %v3041_v43  ;;  %1096 = vmatpush1.bf16.msra.mxu1 %v3044_v44  ;;  %v2680_v43 = vcombine.high %v297_v38, %v297_v38  ;;  %v2679_v44 = vcombine.low %v297_v38, %v297_v38  ;;  %v3182_v38 = vld [vmem:[%s4306_s3 + $0x168] ss:$12 sps:$4 sm:$0xff]  }
  0xec   :  { %1015 = vmatprep.subr.bf16.mxu0 %v3049_v46  ;;  %1097 = vmatprep.subr.bf16.mxu1 %v3052_v47  ;;  %v166_v46 = vmax.f32 %v158_v42, 0.0  ;;  %v3957_v41 = vld [vmem:[%s4307_s7 + $0x1] ss:$8 sm:$0xf] }
  0xed   :  { %v963_v47 = vsel %vm955_vm2, %v2679_v44, 0  ;;  %v304_v42 = vrot.slane %v3957_v41, %v3592_v12  ;;  %v316_v44 = vrot.slane %v3957_v41, %v52_v22  ;;  %v3191_v22 = vld [vmem:[%s4306_s3 + $0x188] ss:$12 sps:$4 sm:$0xff]  }
  0xef   :  { %1016 = vmatpush1.bf16.msra.mxu0 %v3047_v48  ;;  %1098 = vmatpush1.bf16.msra.mxu1 %v3050_v49  ;;  %v3150_v48 = vld [vmem:[%s4306_s3 + $0xc8] ss:$12 sps:$4 sm:$0xff]   ;;  %v3123_v49 = vld [vmem:[%s4306_s3] ss:$12 sps:$4 sm:$0xff]  }
  0xf0   :  { %1017 = vmatprep.subr.bf16.mxu0 %v3055_v50  ;;  %1099 = vmatprep.subr.bf16.mxu1 %v3058_v51  ;;  %v3151_v50 = vld [vmem:[%s4306_s3 + $0x8] ss:$12 sps:$4 sm:$0xff]   ;;  %v170_v51 = vpack.c.bf16 %v166_v46, %v166_v46 }
  0xf3   :  { %1018 = vmatpush1.bf16.msra.mxu0 %v3053_v52  ;;  %1100 = vmatpush1.bf16.msra.mxu1 %v3056_v53  ;;  %v3128_v52 = vld [vmem:[%s4306_s3 + $0x1c] ss:$12 sps:$4 sm:$0xff]   ;;  %v3155_v53 = vld [vmem:[%s4306_s3 + $0xe0] ss:$12 sps:$4 sm:$0xff]  }
  0xf4   :  { %1019 = vmatprep.subr.bf16.mxu0 %v3061_v54  ;;  %1101 = vmatprep.subr.bf16.mxu1 %v3064_v55  ;;  %v3126_v54 = vld [vmem:[%s4306_s3 + $0x18] ss:$12 sps:$4 sm:$0xff]   ;;  %v3156_v55 = vld [vmem:[%s4306_s3 + $0x20] ss:$12 sps:$4 sm:$0xff]  }
  0xf7   :  { %1020 = vmatpush1.bf16.msra.mxu0 %v3059_v56  ;;  %1102 = vmatpush1.bf16.msra.mxu1 %v3062_v57  ;;  %v3131_v56 = vld [vmem:[%s4306_s3 + $0x34] ss:$12 sps:$4 sm:$0xff]   ;;  %v3160_v57 = vld [vmem:[%s4306_s3 + $0xf8] ss:$12 sps:$4 sm:$0xff]  }
  0xf8   :  { %1021 = vmatprep.subr.bf16.mxu0 %v3067_v58  ;;  %1103 = vmatprep.subr.bf16.mxu1 %v3070_v59  ;;  %v3129_v58 = vld [vmem:[%s4306_s3 + $0x30] ss:$12 sps:$4 sm:$0xff]   ;;  %v3161_v59 = vld [vmem:[%s4306_s3 + $0x38] ss:$12 sps:$4 sm:$0xff]  }
  0xfb   :  { %1022 = vmatpush1.bf16.msra.mxu0 %v3065_v60  ;;  %1104 = vmatpush1.bf16.msra.mxu1 %v3068_v61  ;;  %v3134_v60 = vld [vmem:[%s4306_s3 + $0x4c] ss:$12 sps:$4 sm:$0xff]   ;;  %v3165_v61 = vld [vmem:[%s4306_s3 + $0x110] ss:$12 sps:$4 sm:$0xff]  }
  0xfc   :  { %1023 = vmatprep.subr.bf16.mxu0 %v3073_v62  ;;  %1105 = vmatprep.subr.bf16.mxu1 %v3076_v63  ;;  %v3132_v62 = vld [vmem:[%s4306_s3 + $0x48] ss:$12 sps:$4 sm:$0xff]   ;;  %v3166_v63 = vld [vmem:[%s4306_s3 + $0x50] ss:$12 sps:$4 sm:$0xff]  }
  0xff   :  { %1024 = vmatpush1.bf16.msra.mxu0 %v3071_v0  ;;  %1106 = vmatpush1.bf16.msra.mxu1 %v3074_v2  ;;  %v3137_v0 = vld [vmem:[%s4306_s3 + $0x64] ss:$12 sps:$4 sm:$0xff]   ;;  %v3170_v2 = vld [vmem:[%s4306_s3 + $0x128] ss:$12 sps:$4 sm:$0xff]  }
 0x100   :  { %1025 = vmatprep.subr.bf16.mxu0 %v3079_v3  ;;  %1107 = vmatprep.subr.bf16.mxu1 %v3082_v4  ;;  %v3135_v3 = vld [vmem:[%s4306_s3 + $0x60] ss:$12 sps:$4 sm:$0xff]   ;;  %v3171_v4 = vld [vmem:[%s4306_s3 + $0x68] ss:$12 sps:$4 sm:$0xff]  }
 0x103   :  { %1026 = vmatpush1.bf16.msra.mxu0 %v3077_v5  ;;  %1108 = vmatpush1.bf16.msra.mxu1 %v3080_v6  ;;  %v3140_v5 = vld [vmem:[%s4306_s3 + $0x7c] ss:$12 sps:$4 sm:$0xff]   ;;  %v3175_v6 = vld [vmem:[%s4306_s3 + $0x140] ss:$12 sps:$4 sm:$0xff]  }
 0x104   :  { %1027 = vmatprep.subr.bf16.mxu0 %v3085_v7  ;;  %1109 = vmatprep.subr.bf16.mxu1 %v3088_v8  ;;  %v3138_v7 = vld [vmem:[%s4306_s3 + $0x78] ss:$12 sps:$4 sm:$0xff]   ;;  %v3176_v8 = vld [vmem:[%s4306_s3 + $0x80] ss:$12 sps:$4 sm:$0xff]  }
 0x107   :  { %1028 = vmatpush1.bf16.msra.mxu0 %v3083_v9  ;;  %1110 = vmatpush1.bf16.msra.mxu1 %v3086_v10  ;;  %v3143_v9 = vld [vmem:[%s4306_s3 + $0x94] ss:$12 sps:$4 sm:$0xff]   ;;  %v3141_v10 = vld [vmem:[%s4306_s3 + $0x90] ss:$12 sps:$4 sm:$0xff]  }
 0x108   :  { %1029 = vmatprep.subr.bf16.mxu0 %v3091_v15  ;;  %1111 = vmatprep.subr.bf16.mxu1 %v3094_v16  ;;  %v3146_v15 = vld [vmem:[%s4306_s3 + $0xac] ss:$12 sps:$4 sm:$0xff]   ;;  %v3144_v16 = vld [vmem:[%s4306_s3 + $0xa8] ss:$12 sps:$4 sm:$0xff]  }
 0x10b   :  { %1030 = vmatpush1.bf16.msra.mxu0 %v3089_v17  ;;  %1112 = vmatpush1.bf16.msra.mxu1 %v3092_v18  ;;  %v3149_v17 = vld [vmem:[%s4306_s3 + $0xc4] ss:$12 sps:$4 sm:$0xff]   ;;  %v3147_v18 = vld [vmem:[%s4306_s3 + $0xc0] ss:$12 sps:$4 sm:$0xff]  }
 0x10c   :  { %1031 = vmatprep.subr.bf16.mxu0 %v3097_v19  ;;  %1113 = vmatprep.subr.bf16.mxu1 %v3100_v20  ;;  %v3154_v19 = vld [vmem:[%s4306_s3 + $0xdc] ss:$12 sps:$4 sm:$0xff]   ;;  %v3152_v20 = vld [vmem:[%s4306_s3 + $0xd8] ss:$12 sps:$4 sm:$0xff]  }
 0x10f   :  { %1032 = vmatpush1.bf16.msra.mxu0 %v3095_v21  ;;  %1114 = vmatpush1.bf16.msra.mxu1 %v3098_v23  ;;  %v3159_v21 = vld [vmem:[%s4306_s3 + $0xf4] ss:$12 sps:$4 sm:$0xff]   ;;  %v3157_v23 = vld [vmem:[%s4306_s3 + $0xf0] ss:$12 sps:$4 sm:$0xff]  }
 0x110   :  { %1033 = vmatprep.subr.bf16.mxu0 %v3103_v24  ;;  %1115 = vmatprep.subr.bf16.mxu1 %v3106_v25  ;;  %v3164_v24 = vld [vmem:[%s4306_s3 + $0x10c] ss:$12 sps:$4 sm:$0xff]   ;;  %v3162_v25 = vld [vmem:[%s4306_s3 + $0x108] ss:$12 sps:$4 sm:$0xff]  }
 0x113   :  { %1034 = vmatpush1.bf16.msra.mxu0 %v3101_v26  ;;  %1116 = vmatpush1.bf16.msra.mxu1 %v3104_v27  ;;  %v3169_v26 = vld [vmem:[%s4306_s3 + $0x124] ss:$12 sps:$4 sm:$0xff]   ;;  %v3167_v27 = vld [vmem:[%s4306_s3 + $0x120] ss:$12 sps:$4 sm:$0xff]  }
 0x114   :  { %1035 = vmatprep.subr.bf16.mxu0 %v3109_v29  ;;  %1117 = vmatprep.subr.bf16.mxu1 %v3112_v30  ;;  %v3174_v29 = vld [vmem:[%s4306_s3 + $0x13c] ss:$12 sps:$4 sm:$0xff]   ;;  %v3172_v30 = vld [vmem:[%s4306_s3 + $0x138] ss:$12 sps:$4 sm:$0xff]  }
 0x117   :  { %1036 = vmatpush1.bf16.msra.mxu0 %v3107_v31  ;;  %1118 = vmatpush1.bf16.msra.mxu1 %v3110_v32  ;;  %v3179_v31 = vld [vmem:[%s4306_s3 + $0x154] ss:$12 sps:$4 sm:$0xff]   ;;  %v3180_v32 = vld [vmem:[%s4306_s3 + $0x158] ss:$12 sps:$4 sm:$0xff]  }
 0x118   :  { %1037 = vmatprep.subr.bf16.mxu0 %v3115_v35  ;;  %1119 = vmatprep.subr.bf16.mxu1 %v3118_v36  ;;  %v3181_v35 = vld [vmem:[%s4306_s3 + $0x98] ss:$12 sps:$4 sm:$0xff]  }
 0x119   :  { %v3184_v36 = vld [vmem:[%s4306_s3 + $0x16c] ss:$12 sps:$4 sm:$0xff]  }
 0x11b   :  { %1038 = vmatpush1.bf16.msra.mxu0 %v3113_v13  ;;  %1120 = vmatpush1.bf16.msra.mxu1 %v3116_v39  ;;  %v3186_v13 = vld [vmem:[%s4306_s3 + $0xb0] ss:$12 sps:$4 sm:$0xff]  }
 0x11c   :  { %2681 = vmatprep.subr.msk.bf16.mxu0 %vm955_vm2, %v2678_v40  ;;  %2683 = vmatprep.subr.msk.bf16.mxu1 %vm955_vm2, %v2680_v43  ;;  %v3189_v39 = vld [vmem:[%s4306_s3 + $0x184] ss:$12 sps:$4 sm:$0xff]   ;;  %v3190_v40 = vld [vmem:[%s4306_s3 + $0x248] ss:$12 sps:$4 sm:$0xff]   ;;  %v308_v43 = vrot.slane %v3957_v41, %v3600_v14 }
 0x11f   :  { %1040 = vmatpush1.bf16.msra.mxu0 %v957_v45  ;;  %1122 = vmatpush1.bf16.msra.mxu1 %v963_v47 }
 0x120   :  { %1800 = vmatprep.subr.bf16.mxu0 %v3125_v33  ;;  %2842 = vmatprep.subr.bf16.mxu1 %v3150_v48 }
 0x122   :  { %1042 = vmatmul.mubr.bf16.vlgmr.msra.gmra.mrb[0].mxu0 %v170_v51  ;;  %1124 = vmatmul.mubr.bf16.vlgmr.msra.gmra.mrb[8].mxu1 %v170_v51 }
 0x123   :  { %1801 = vmatpush1.bf16.msra.mxu0 %v3123_v49  ;;  %2843 = vmatpush3.bf16.msra.mxu1 %v3151_v50 }
 0x124   :  { %1802 = vmatprep.subr.bf16.mxu0 %v3128_v52  ;;  %2844 = vmatprep.subr.bf16.mxu1 %v3155_v53 }
 0x127   :  { %1803 = vmatpush1.bf16.msra.mxu0 %v3126_v54  ;;  %2845 = vmatpush3.bf16.msra.mxu1 %v3156_v55 }
 0x128   :  { %1804 = vmatprep.subr.bf16.mxu0 %v3131_v56  ;;  %2846 = vmatprep.subr.bf16.mxu1 %v3160_v57 }
 0x12b   :  { %1805 = vmatpush1.bf16.msra.mxu0 %v3129_v58  ;;  %2847 = vmatpush3.bf16.msra.mxu1 %v3161_v59 }
 0x12c   :  { %1806 = vmatprep.subr.bf16.mxu0 %v3134_v60  ;;  %2848 = vmatprep.subr.bf16.mxu1 %v3165_v61  ;;  %v3194_v60 = vld [vmem:[%s4306_s3 + $0x19c] ss:$12 sps:$4 sm:$0xff]   ;;  %v3195_v61 = vld [vmem:[%s4306_s3 + $0x260] ss:$12 sps:$4 sm:$0xff]  }
 0x12f   :  { %1807 = vmatpush1.bf16.msra.mxu0 %v3132_v62  ;;  %2849 = vmatpush3.bf16.msra.mxu1 %v3166_v63  ;;  %v3192_v63 = vld [vmem:[%s4306_s3 + $0x198] ss:$12 sps:$4 sm:$0xff]  }
 0x130   :  { %1808 = vmatprep.subr.bf16.mxu0 %v3137_v0  ;;  %2850 = vmatprep.subr.bf16.mxu1 %v3170_v2  ;;  %v3196_v0 = vld [vmem:[%s4306_s3 + $0x1a0] ss:$12 sps:$4 sm:$0xff]  }
 0x131   :  { %v3199_v2 = vld [vmem:[%s4306_s3 + $0x1b4] ss:$12 sps:$4 sm:$0xff]  }
 0x133   :  { %1809 = vmatpush1.bf16.msra.mxu0 %v3135_v3  ;;  %2851 = vmatpush3.bf16.msra.mxu1 %v3171_v4  ;;  %v3200_v3 = vld [vmem:[%s4306_s3 + $0x278] ss:$12 sps:$4 sm:$0xff]   ;;  %v3197_v4 = vld [vmem:[%s4306_s3 + $0x1b0] ss:$12 sps:$4 sm:$0xff]  }
 0x134   :  { %1810 = vmatprep.subr.bf16.mxu0 %v3140_v5  ;;  %2852 = vmatprep.subr.bf16.mxu1 %v3175_v6  ;;  %v3201_v5 = vld [vmem:[%s4306_s3 + $0x1b8] ss:$12 sps:$4 sm:$0xff]  }
 0x135   :  { %v3204_v6 = vld [vmem:[%s4306_s3 + $0x1cc] ss:$12 sps:$4 sm:$0xff]  }
 0x137   :  { %1811 = vmatpush1.bf16.msra.mxu0 %v3138_v7  ;;  %2853 = vmatpush3.bf16.msra.mxu1 %v3176_v8  ;;  %v3205_v7 = vld [vmem:[%s4306_s3 + $0x290] ss:$12 sps:$4 sm:$0xff]   ;;  %v3202_v8 = vld [vmem:[%s4306_s3 + $0x1c8] ss:$12 sps:$4 sm:$0xff]  }
 0x138   :  { %1812 = vmatprep.subr.bf16.mxu0 %v3143_v9  ;;  %2854 = vmatprep.subr.bf16.mxu1 %v3180_v32  ;;  %v3206_v9 = vld [vmem:[%s4306_s3 + $0x1d0] ss:$12 sps:$4 sm:$0xff]   ;;  %v3222_v32 = vld [vmem:[%s4306_s3 + $0x228] ss:$12 sps:$4 sm:$0xff]  }
 0x13b   :  { %1813 = vmatpush1.bf16.msra.mxu0 %v3141_v10  ;;  %2855 = vmatpush3.bf16.msra.mxu1 %v3181_v35  ;;  %v3209_v10 = vld [vmem:[%s4306_s3 + $0x1e4] ss:$12 sps:$4 sm:$0xff]  }
 0x13c   :  { %1814 = vmatprep.subr.bf16.mxu0 %v3146_v15  ;;  %2856 = vmatprep.subr.bf16.mxu1 %v3185_v37  ;;  %v3210_v15 = vld [vmem:[%s4306_s3 + $0x2a8] ss:$12 sps:$4 sm:$0xff]   ;;  %v3227_v37 = vld [vmem:[%s4306_s3 + $0x240] ss:$12 sps:$4 sm:$0xff]  }
 0x13f   :  { %1815 = vmatpush1.bf16.msra.mxu0 %v3144_v16  ;;  %2857 = vmatpush3.bf16.msra.mxu1 %v3186_v13  ;;  %v3207_v16 = vld [vmem:[%s4306_s3 + $0x1e0] ss:$12 sps:$4 sm:$0xff]   ;;  %v3232_v13 = vld [vmem:[%s4306_s3 + $0x25c] ss:$12 sps:$4 sm:$0xff]  }
 0x140   :  { %1816 = vmatprep.subr.bf16.mxu0 %v3149_v17  ;;  %2864 = vmatprep.subr.bf16.mxu1 %v3190_v40  ;;  %v3211_v17 = vld [vmem:[%s4306_s3 + $0x1e8] ss:$12 sps:$4 sm:$0xff]  }
 0x141   :  { %v3235_v40 = vld [vmem:[%s4306_s3 + $0x274] ss:$12 sps:$4 sm:$0xff]  }
 0x143   :  { %1817 = vmatpush1.bf16.msra.mxu0 %v3147_v18  ;;  %v3214_v18 = vld [vmem:[%s4306_s3 + $0x1fc] ss:$12 sps:$4 sm:$0xff]  }
 0x144   :  { %1818 = vmatprep.subr.bf16.mxu0 %v3154_v19  ;;  %v3215_v19 = vld [vmem:[%s4306_s3 + $0x2c0] ss:$12 sps:$4 sm:$0xff]  }
 0x147   :  { %1819 = vmatpush1.bf16.msra.mxu0 %v3152_v20  ;;  %v3212_v20 = vld [vmem:[%s4306_s3 + $0x1f8] ss:$12 sps:$4 sm:$0xff]  }
 0x148   :  { %1820 = vmatprep.subr.bf16.mxu0 %v3159_v21  ;;  %v3216_v21 = vld [vmem:[%s4306_s3 + $0x200] ss:$12 sps:$4 sm:$0xff]  }
 0x14b   :  { %1821 = vmatpush1.bf16.msra.mxu0 %v3157_v23  ;;  %v312_v23 = vrot.slane %v3957_v41, %v3765_v28  ;;  %v3233_v41 = vld [vmem:[%s4306_s3 + $0x270] ss:$12 sps:$4 sm:$0xff]  }
 0x14c   :  { %1822 = vmatprep.subr.bf16.mxu0 %v3164_v24  ;;  %v3219_v24 = vld [vmem:[%s4306_s3 + $0x214] ss:$12 sps:$4 sm:$0xff]  }
 0x14f   :  { %1823 = vmatpush1.bf16.msra.mxu0 %v3162_v25  ;;  %v3220_v25 = vld [vmem:[%s4306_s3 + $0x2d8] ss:$12 sps:$4 sm:$0xff]  }
 0x150   :  { %1824 = vmatprep.subr.bf16.mxu0 %v3169_v26  ;;  %v3217_v26 = vld [vmem:[%s4306_s3 + $0x210] ss:$12 sps:$4 sm:$0xff]  }
 0x153   :  { %1825 = vmatpush1.bf16.msra.mxu0 %v3167_v27  ;;  %v3221_v27 = vld [vmem:[%s4306_s3 + $0x218] ss:$12 sps:$4 sm:$0xff]  }
 0x154   :  { %1826 = vmatprep.subr.bf16.mxu0 %v3174_v29 }
 0x157   :  { %1827 = vmatpush1.bf16.msra.mxu0 %v3172_v30  ;;  %v3224_v30 = vld [vmem:[%s4306_s3 + $0x22c] ss:$12 sps:$4 sm:$0xff]  }
 0x158   :  { %1828 = vmatprep.subr.bf16.mxu0 %v3179_v31  ;;  %v3225_v31 = vld [vmem:[%s4306_s3 + $0x2f0] ss:$0 sps:$4 sm:$0x33]  }
 0x15b   :  { %1829 = vmatpush1.bf16.msra.mxu0 %v3177_v34  ;;  %v3226_v34 = vld [vmem:[%s4306_s3 + $0x230] ss:$12 sps:$4 sm:$0xff]  }
 0x15c   :  { %1830 = vmatprep.subr.bf16.mxu0 %v3184_v36  ;;  %v3229_v36 = vld [vmem:[%s4306_s3 + $0x244] ss:$12 sps:$4 sm:$0xff]  }
 0x15f   :  { %1831 = vmatpush1.bf16.msra.mxu0 %v3182_v38 }
 0x160   :  { %1841 = vmatprep.subr.bf16.mxu0 %v3189_v39  ;;  %v3230_v39 = vld [vmem:[%s4306_s3 + $0x258] ss:$12 sps:$4 sm:$0xff]  }
 0x1f5   :  { %v1043_v45 = vpop.f32.mrb[0].mxu0  ;;  %v3966_v46 = vpop.f32.mrb[8].mxu1 }
 0x1f6   :  { %v2894_v47 = vadd.f32 %v1043_v45, %v304_v42  ;;  %v1045_v33 = vpop.f32.mrb[1].mxu0  ;;  %v1127_v48 = vpop.f32.mrb[9].mxu1  ;;  %v2896_v29 = vadd.f32 %v3966_v46, %v312_v23  ;;  %v3238_v42 = vld [vmem:[%s4306_s3 + $0x28c] ss:$12 sps:$4 sm:$0xff]   ;;  %v3244_v46 = vld [vmem:[%s4306_s3 + $0x2bc] ss:$12 sps:$4 sm:$0xff]  }
 0x1f7   :  { %v2895_v49 = vadd.f32 %v1045_v33, %v308_v43  ;;  %v2897_v50 = vadd.f32 %v1127_v48, %v316_v44  ;;  %v1047_v51 = vpop.f32.mrb[2].mxu0  ;;  %v1129_v52 = vpop.f32.mrb[10].mxu1  ;;  %v3236_v43 = vld [vmem:[%s4306_s3 + $0x288] ss:$12 sps:$4 sm:$0xff]   ;;  %v3241_v44 = vld [vmem:[%s4306_s3 + $0x2a4] ss:$12 sps:$4 sm:$0xff]  }
 0x1f8   :  { %v1132_v53 = vmax.f32 %v2894_v47, 0.0  ;;  %v1048_v54 = vpop.f32.mrb[3].mxu0  ;;  %v1130_v55 = vpop.f32.mrb[11].mxu1  ;;  %v1134_v35 = vmax.f32 %v2896_v29, 0.0  ;;  %v3239_v45 = vld [vmem:[%s4306_s3 + $0x2a0] ss:$12 sps:$4 sm:$0xff]  }
 0x1f9   :  { %v1133_v56 = vmax.f32 %v2895_v49, 0.0  ;;  %v1135_v57 = vmax.f32 %v2897_v50, 0.0  ;;  %v3242_v47 = vld [vmem:[%s4306_s3 + $0x2b8] ss:$12 sps:$4 sm:$0xff]   ;;  %v3247_v33 = vld [vmem:[%s4306_s3 + $0x2d4] ss:$12 sps:$4 sm:$0xff]  }
 0x1fa   :  { %v1136_v59 = vpack.c.bf16 %v1132_v53, %v1132_v53  ;;  %v1138_v38 = vpack.c.bf16 %v1134_v35, %v1134_v35  ;;  %v1264_v48 = vld [vmem:[%s4306_s3 + $0x2e8] sm:$0x33]  ;;  %v3245_v49 = vld [vmem:[%s4306_s3 + $0x2d0] ss:$12 sps:$4 sm:$0xff]  }
 0x1fb   :  { %v1137_v58 = vpack.c.bf16 %v1133_v56, %v1133_v56  ;;  %v1139_v62 = vpack.c.bf16 %v1135_v57, %v1135_v57  ;;  %v2780_v50 = vcombine.high %v1264_v48, %v1264_v48  ;;  %v2779_v51 = vcombine.low %v1264_v48, %v1264_v48  ;;  %v3250_v53 = vld [vmem:[%s4308_s4] ss:$8 sps:$4 sm:$0xff]   ;;  %v3252_v54 = vld [vmem:[%s4308_s4 + $0x4] ss:$8 sps:$4 sm:$0xff]   ;;  %v3255_v55 = vld [vmem:[%s4308_s4 + $0x14] ss:$8 sps:$4 sm:$0xff]  }
 0x1fc   :  { %v3253_v56 = vld [vmem:[%s4308_s4 + $0x10] ss:$8 sps:$4 sm:$0xff]   ;;  %v3258_v57 = vld [vmem:[%s4308_s4 + $0x24] ss:$8 sps:$4 sm:$0xff]   ;;  %v3297_v23 = vld [vmem:[%s4308_s4 + $0xf4] ss:$8 sps:$4 sm:$0xff]  }
 0x1fd   :  { %1832 = vmatprep.mubr.bf16.mxu0 %v1137_v58  ;;  %1914 = vmatprep.mubr.bf16.mxu1 %v1137_v58  ;;  %v1792_v52 = vsel %vm955_vm2, %v2779_v51, 0  ;;  %v3256_v58 = vld [vmem:[%s4308_s4 + $0x20] ss:$8 sps:$4 sm:$0xff]   ;;  %v3309_v29 = vld [vmem:[%s4309_s5 + $0x10] sm:$0xff]   ;;  %v3314_v35 = vld [vmem:[%s4309_s5 + $0x38] sm:$0xff]  }
 0x1fe   :  { %1833 = vmatmul.mubr.bf16.vlgmr.msra.gmra.mrb[4].mxu0 %v1136_v59  ;;  %1915 = vmatmul.mubr.bf16.vlgmr.msra.gmra.mrb[12].mxu1 %v1136_v59  ;;  %v3264_v59 = vld [vmem:[%s4308_s4 + $0x44] ss:$8 sps:$4 sm:$0xff]  }
 0x1ff   :  { %1842 = vmatpush1.bf16.msra.mxu0 %v3187_v11  ;;  %2865 = vmatpush3.bf16.msra.mxu1 %v3191_v22  ;;  %v3261_v11 = vld [vmem:[%s4308_s4 + $0x34] ss:$8 sps:$4 sm:$0xff]   ;;  %v3259_v22 = vld [vmem:[%s4308_s4 + $0x30] ss:$8 sps:$4 sm:$0xff]  }
 0x200   :  { %2783 = vmatprep.mubr.msk.bf16.mxu0 %vm951_vm1, %v1139_v62  ;;  %2784 = vmatprep.mubr.msk.bf16.mxu1 %vm951_vm1, %v1139_v62  ;;  %v3265_v62 = vld [vmem:[%s4308_s4 + $0x50] ss:$8 sps:$4 sm:$0xff]  }
 0x201   :  { %1843 = vmatprep.subr.bf16.mxu0 %v3194_v60  ;;  %2866 = vmatprep.subr.bf16.mxu1 %v3195_v61  ;;  %v3262_v60 = vld [vmem:[%s4308_s4 + $0x40] ss:$8 sps:$4 sm:$0xff]   ;;  %v3267_v61 = vld [vmem:[%s4308_s4 + $0x54] ss:$8 sps:$4 sm:$0xff]  }
 0x203   :  { %1844 = vmatpush1.bf16.msra.mxu0 %v3192_v63  ;;  %2867 = vmatpush3.bf16.msra.mxu1 %v3196_v0  ;;  %v3270_v63 = vld [vmem:[%s4308_s4 + $0x64] ss:$8 sps:$4 sm:$0xff]   ;;  %v3268_v0 = vld [vmem:[%s4308_s4 + $0x60] ss:$8 sps:$4 sm:$0xff]  }
 0x204   :  { %1845 = vmatprep.subr.bf16.mxu0 %v3199_v2  ;;  %2868 = vmatprep.subr.bf16.mxu1 %v3200_v3  ;;  %v3273_v2 = vld [vmem:[%s4308_s4 + $0x74] ss:$8 sps:$4 sm:$0xff]   ;;  %v3271_v3 = vld [vmem:[%s4308_s4 + $0x70] ss:$8 sps:$4 sm:$0xff]  }
 0x207   :  { %1846 = vmatpush1.bf16.msra.mxu0 %v3197_v4  ;;  %2869 = vmatpush3.bf16.msra.mxu1 %v3201_v5  ;;  %v3276_v4 = vld [vmem:[%s4308_s4 + $0x84] ss:$8 sps:$4 sm:$0xff]   ;;  %v3274_v5 = vld [vmem:[%s4308_s4 + $0x80] ss:$8 sps:$4 sm:$0xff]  }
 0x208   :  { %1847 = vmatprep.subr.bf16.mxu0 %v3204_v6  ;;  %2870 = vmatprep.subr.bf16.mxu1 %v3205_v7  ;;  %v3279_v6 = vld [vmem:[%s4308_s4 + $0x94] ss:$8 sps:$4 sm:$0xff]   ;;  %v3277_v7 = vld [vmem:[%s4308_s4 + $0x90] ss:$8 sps:$4 sm:$0xff]  }
 0x20b   :  { %1848 = vmatpush1.bf16.msra.mxu0 %v3202_v8  ;;  %2871 = vmatpush3.bf16.msra.mxu1 %v3206_v9  ;;  %v3282_v8 = vld [vmem:[%s4308_s4 + $0xa4] ss:$8 sps:$4 sm:$0xff]   ;;  %v3280_v9 = vld [vmem:[%s4308_s4 + $0xa0] ss:$8 sps:$4 sm:$0xff]  }
 0x20c   :  { %1849 = vmatprep.subr.bf16.mxu0 %v3209_v10  ;;  %2872 = vmatprep.subr.bf16.mxu1 %v3210_v15  ;;  %v3285_v10 = vld [vmem:[%s4308_s4 + $0xb4] ss:$8 sps:$4 sm:$0xff]   ;;  %v3283_v15 = vld [vmem:[%s4308_s4 + $0xb0] ss:$8 sps:$4 sm:$0xff]  }
 0x20f   :  { %1850 = vmatpush1.bf16.msra.mxu0 %v3207_v16  ;;  %2873 = vmatpush3.bf16.msra.mxu1 %v3211_v17  ;;  %v3288_v16 = vld [vmem:[%s4308_s4 + $0xc4] ss:$8 sps:$4 sm:$0xff]   ;;  %v3286_v17 = vld [vmem:[%s4308_s4 + $0xc0] ss:$8 sps:$4 sm:$0xff]  }
 0x210   :  { %1851 = vmatprep.subr.bf16.mxu0 %v3214_v18  ;;  %2874 = vmatprep.subr.bf16.mxu1 %v3215_v19  ;;  %v3291_v18 = vld [vmem:[%s4308_s4 + $0xd4] ss:$8 sps:$4 sm:$0xff]   ;;  %v3289_v19 = vld [vmem:[%s4308_s4 + $0xd0] ss:$8 sps:$4 sm:$0xff]  }
 0x213   :  { %1852 = vmatpush1.bf16.msra.mxu0 %v3212_v20  ;;  %2875 = vmatpush3.bf16.msra.mxu1 %v3216_v21  ;;  %v3294_v20 = vld [vmem:[%s4308_s4 + $0xe4] ss:$8 sps:$4 sm:$0xff]   ;;  %v3292_v21 = vld [vmem:[%s4308_s4 + $0xe0] ss:$8 sps:$4 sm:$0xff]  }
 0x214   :  { %1853 = vmatprep.subr.bf16.mxu0 %v3219_v24  ;;  %2876 = vmatprep.subr.bf16.mxu1 %v3220_v25  ;;  %v3295_v24 = vld [vmem:[%s4308_s4 + $0xf0] ss:$8 sps:$4 sm:$0xff]   ;;  %v3300_v25 = vld [vmem:[%s4308_s4 + $0x104] ss:$8 sps:$4 sm:$0xff]  }
 0x217   :  { %1854 = vmatpush1.bf16.msra.mxu0 %v3217_v26  ;;  %2877 = vmatpush3.bf16.msra.mxu1 %v3221_v27  ;;  %v3307_v26 = vld [vmem:[%s4309_s5] sm:$0xff]   ;;  %v3308_v27 = vld [vmem:[%s4309_s5 + $0x8] sm:$0xff]  }
 0x218   :  { %1855 = vmatprep.subr.bf16.mxu0 %v3224_v30  ;;  %2918 = vmatprep.subr.msk.bf16.mxu1 %vm955_vm2, %v3225_v31  ;;  %v3310_v30 = vld [vmem:[%s4309_s5 + $0x18] sm:$0xff]   ;;  %v3311_v31 = vld [vmem:[%s4309_s5 + $0x20] sm:$0xff]  }
 0x21b   :  { %1856 = vmatpush1.bf16.msra.mxu0 %v3222_v32  ;;  %2879 = vmatpush3.bf16.msra.mxu1 %v3226_v34  ;;  %v3312_v32 = vld [vmem:[%s4309_s5 + $0x28] sm:$0xff]   ;;  %v3313_v34 = vld [vmem:[%s4309_s5 + $0x30] sm:$0xff]  }
 0x21c   :  { %1857 = vmatprep.subr.bf16.mxu0 %v3229_v36  ;;  %2218 = vmatprep.subr.bf16.mxu1 %v3252_v54  ;;  %v3315_v36 = vld [vmem:[%s4309_s5 + $0x40] sm:$0xff]  }
 0x21e   :  { %1955 = vmatmul.mubr.bf16.vlgmr.msra.gmra.mrb[16].mxu1 %v1138_v38 }
 0x21f   :  { %1858 = vmatpush1.bf16.msra.mxu0 %v3227_v37  ;;  %2219 = vmatpush1.bf16.msra.mxu1 %v3250_v53  ;;  %v3316_v37 = vld [vmem:[%s4309_s5 + $0x48] sm:$0xff]  }
 0x220   :  { %1859 = vmatprep.subr.bf16.mxu0 %v3232_v13  ;;  %2220 = vmatprep.subr.bf16.mxu1 %v3255_v55 }
 0x223   :  { %1860 = vmatpush1.bf16.msra.mxu0 %v3230_v39  ;;  %2221 = vmatpush1.bf16.msra.mxu1 %v3253_v56 }
 0x224   :  { %1861 = vmatprep.subr.bf16.mxu0 %v3235_v40  ;;  %2222 = vmatprep.subr.bf16.mxu1 %v3258_v57 }
 0x227   :  { %1862 = vmatpush1.bf16.msra.mxu0 %v3233_v41  ;;  %2223 = vmatpush1.bf16.msra.mxu1 %v3256_v58 }
 0x228   :  { %1863 = vmatprep.subr.bf16.mxu0 %v3238_v42  ;;  %2224 = vmatprep.subr.bf16.mxu1 %v3261_v11 }
 0x22b   :  { %1864 = vmatpush1.bf16.msra.mxu0 %v3236_v43  ;;  %2225 = vmatpush1.bf16.msra.mxu1 %v3259_v22  ;;  %v2685_v43 = vld [vmem:[%s4307_s7 + $0x2] ss:$8 sm:$0x7] }
 0x22c   :  { %1865 = vmatprep.subr.bf16.mxu0 %v3241_v44  ;;  %2226 = vmatprep.subr.bf16.mxu1 %v3264_v59  ;;  %v1280_v44 = vrot.slane %v2685_v43, %v3765_v28  ;;  %v1272_v51 = vrot.slane %v2685_v43, %v3592_v12  ;;  %v3298_v59 = vld [vmem:[%s4308_s4 + $0x100] ss:$8 sps:$4 sm:$0xff]  }
 0x22f   :  { %1866 = vmatpush1.bf16.msra.mxu0 %v3239_v45  ;;  %2227 = vmatpush1.bf16.msra.mxu1 %v3262_v60 }
 0x230   :  { %1867 = vmatprep.subr.bf16.mxu0 %v3244_v46  ;;  %2228 = vmatprep.subr.bf16.mxu1 %v3267_v61  ;;  %v3303_v61 = vld [vmem:[%s4308_s4 + $0x114] ss:$8 sps:$4 sm:$0xff]  }
 0x233   :  { %1868 = vmatpush1.bf16.msra.mxu0 %v3242_v47  ;;  %2229 = vmatpush1.bf16.msra.mxu1 %v3265_v62  ;;  %v3301_v62 = vld [vmem:[%s4308_s4 + $0x110] ss:$8 sps:$4 sm:$0xff]  }
 0x234   :  { %1869 = vmatprep.subr.bf16.mxu0 %v3247_v33  ;;  %2230 = vmatprep.subr.bf16.mxu1 %v3270_v63  ;;  %v3304_v63 = vld [vmem:[%s4308_s4 + $0x124] ss:$8 sps:$4 sm:$0x3f]  }
 0x237   :  { %1870 = vmatpush1.bf16.msra.mxu0 %v3245_v49  ;;  %2231 = vmatpush1.bf16.msra.mxu1 %v3268_v0  ;;  %v3306_v0 = vld [vmem:[%s4308_s4 + $0x120] ss:$8 sps:$4 sm:$0x3f]  }
 0x238   :  { %2782 = vmatprep.subr.msk.bf16.mxu0 %vm955_vm2, %v2780_v50  ;;  %2232 = vmatprep.subr.bf16.mxu1 %v3273_v2 }
 0x23b   :  { %1872 = vmatpush1.bf16.msra.mxu0 %v1792_v52  ;;  %2233 = vmatpush1.bf16.msra.mxu1 %v3271_v3  ;;  %v1276_v52 = vrot.slane %v2685_v43, %v3600_v14  ;;  %v2213_v3 = vsel %vm2211_vm3, %v3306_v0, 0 }
 0x23c   :  { %2413 = vmatprep.subr.bf16.mxu0 %v3321_v1  ;;  %2234 = vmatprep.subr.bf16.mxu1 %v3276_v4 }
 0x23e   :  { %1874 = vmatmul.mubr.bf16.vlgmr.msra.gmra.mrb[4].mxu0 %v1138_v38  ;;  %v3317_v38 = vld [vmem:[%s4309_s5 + $0x50] sm:$0xff]  }
 0x23f   :  { %2235 = vmatpush1.bf16.msra.mxu1 %v3274_v5  ;;  %2414 = vmatpush1.bf16.msra.mxu0 %v3307_v26  ;;  %v3318_v5 = vld [vmem:[%s4309_s5 + $0x58] sm:$0xff]  }
 0x240   :  { %2236 = vmatprep.subr.bf16.mxu1 %v3279_v6  ;;  %2415 = vmatprep.subr.bf16.mxu0 %v3321_v1  ;;  %v3319_v6 = vld [vmem:[%s4309_s5 + $0x60] ss:$0 sps:$4 sm:$0xff]  }
 0x243   :  { %2237 = vmatpush1.bf16.msra.mxu1 %v3277_v7  ;;  %2416 = vmatpush1.bf16.msra.mxu0 %v3308_v27  ;;  %v2411_v7 = vsel %vm2409_vm5, %v3319_v6, 0 }
 0x244   :  { %2238 = vmatprep.subr.bf16.mxu1 %v3282_v8  ;;  %2417 = vmatprep.subr.bf16.mxu0 %v3321_v1  ;;  %v3322_v8 = vmov 0.0  }
 0x247   :  { %2239 = vmatpush1.bf16.msra.mxu1 %v3280_v9  ;;  %2418 = vmatpush1.bf16.msra.mxu0 %v3309_v29  ;;  %v3320_v9 = vld [vmem:[%s4310_s6] sm:$0x1f]  }
 0x248   :  { %2240 = vmatprep.subr.bf16.mxu1 %v3285_v10  ;;  %2419 = vmatprep.subr.bf16.mxu0 %v3321_v1  ;;  %v2469_v10 = vsel %vm2467_vm6, %v3320_v9, 0 }
 0x24b   :  { %2241 = vmatpush1.bf16.msra.mxu1 %v3283_v15  ;;  %2420 = vmatpush1.bf16.msra.mxu0 %v3310_v30 }
 0x24c   :  { %2242 = vmatprep.subr.bf16.mxu1 %v3288_v16  ;;  %2421 = vmatprep.subr.bf16.mxu0 %v3321_v1 }
 0x24f   :  { %2243 = vmatpush1.bf16.msra.mxu1 %v3286_v17  ;;  %2422 = vmatpush1.bf16.msra.mxu0 %v3311_v31 }
 0x250   :  { %2244 = vmatprep.subr.bf16.mxu1 %v3291_v18  ;;  %2423 = vmatprep.subr.bf16.mxu0 %v3321_v1 }
 0x253   :  { %2245 = vmatpush1.bf16.msra.mxu1 %v3289_v19  ;;  %2424 = vmatpush1.bf16.msra.mxu0 %v3312_v32 }
 0x254   :  { %2246 = vmatprep.subr.bf16.mxu1 %v3294_v20  ;;  %2425 = vmatprep.subr.bf16.mxu0 %v3321_v1 }
 0x257   :  { %2247 = vmatpush1.bf16.msra.mxu1 %v3292_v21  ;;  %2426 = vmatpush1.bf16.msra.mxu0 %v3313_v34 }
 0x258   :  { %2248 = vmatprep.subr.bf16.mxu1 %v3297_v23  ;;  %2427 = vmatprep.subr.bf16.mxu0 %v3321_v1 }
 0x25b   :  { %2249 = vmatpush1.bf16.msra.mxu1 %v3295_v24  ;;  %2428 = vmatpush1.bf16.msra.mxu0 %v3314_v35 }
 0x25c   :  { %2259 = vmatprep.subr.bf16.mxu1 %v3300_v25  ;;  %2429 = vmatprep.subr.bf16.mxu0 %v3321_v1 }
 0x25f   :  { %2430 = vmatpush1.bf16.msra.mxu0 %v3315_v36  ;;  %v2457_v36 = vld [vmem:[%s4307_s7 + $0x5] ss:$0 sm:$0xff] }
 0x260   :  { %2431 = vmatprep.subr.bf16.mxu0 %v3321_v1 }
 0x263   :  { %2432 = vmatpush1.bf16.msra.mxu0 %v3316_v37 }
 0x264   :  { %2433 = vmatprep.subr.bf16.mxu0 %v3321_v1 }
 0x267   :  { %2434 = vmatpush1.bf16.msra.mxu0 %v3317_v38 }
 0x268   :  { %2435 = vmatprep.subr.bf16.mxu0 %v3321_v1 }
 0x26b   :  { %2436 = vmatpush1.bf16.msra.mxu0 %v3318_v5 }
 0x26c   :  { %2437 = vmatprep.subr.bf16.mxu0 %v3321_v1 }
 0x26f   :  { %2438 = vmatpush1.bf16.msra.mxu0 %v2411_v7 }
 0x2d1   :  { %v2858_v13 = vpop.f32.mrb[12].mxu1 }
 0x2d2   :  { %v2859_v39 = vpop.f32.mrb[13].mxu1 }
 0x2d3   :  { %v2860_v40 = vadd.f32 %v2859_v39, %v2858_v13  ;;  %v2861_v41 = vpop.f32.mrb[14].mxu1 }
 0x2d4   :  { %v2862_v42 = vpop.f32.mrb[15].mxu1 }
 0x2d5   :  { %v1917_v47 = vadd.f32 %v2860_v40, %v1280_v44 }
 0x2f1   :  { %v2880_v45 = vpop.f32.mrb[16].mxu1 }
 0x2f2   :  { %v2881_v46 = vpop.f32.mrb[17].mxu1 }
 0x2f3   :  { %v2882_v33 = vadd.f32 %v2881_v46, %v2880_v45  ;;  %v2883_v48 = vpop.f32.mrb[18].mxu1 }
 0x2f4   :  { %v2884_v49 = vpop.f32.mrb[19].mxu1 }
 0x2f5   :  { %v1957_v50 = vadd.f32 %v2882_v33, %v1917_v47 }
 0x2f7   :  { %v1964_v2 = vmax.f32 %v1957_v50, 0.0 }
 0x2f9   :  { %v1967_v4 = vpack.c.bf16 %v1964_v2, %v1964_v2 }
 0x311   :  { %v1875_v53 = vpop.f32.mrb[4].mxu0 }
 0x312   :  { %v2898_v54 = vadd.f32 %v1875_v53, %v1272_v51  ;;  %v1877_v55 = vpop.f32.mrb[5].mxu0 }
 0x313   :  { %v2899_v56 = vadd.f32 %v1877_v55, %v1276_v52  ;;  %v1879_v57 = vpop.f32.mrb[6].mxu0 }
 0x314   :  { %v1962_v58 = vmax.f32 %v2898_v54, 0.0  ;;  %v1880_v11 = vpop.f32.mrb[7].mxu0 }
 0x315   :  { %v1963_v22 = vmax.f32 %v2899_v56, 0.0 }
 0x316   :  { %v1965_v60 = vpack.c.bf16 %v1962_v58, %v1962_v58 }
 0x317   :  { %v1966_v28 = vpack.c.bf16 %v1963_v22, %v1963_v22 }
 0x319   :  { %2250 = vmatprep.mubr.bf16.mxu1 %v1966_v28 }
 0x31a   :  { %2251 = vmatmul.mubr.bf16.vlgmr.msra.gmra.mrb[20].mxu1 %v1965_v60 }
 0x31b   :  { %2260 = vmatpush1.bf16.msra.mxu1 %v3298_v59  ;;  %2291 = vmatprep.mubr.bf16.mxu1 %v3321_v1  ;;  %v2785_v1 = vld [vmem:[%s4307_s7 + $0x3] ss:$8 sm:$0x3] }
 0x31c   :  { %2261 = vmatprep.subr.bf16.mxu1 %v3303_v61  ;;  %v2012_v15 = vrot.slane %v2785_v1, %v3592_v12  ;;  %v2016_v16 = vrot.slane %v2785_v1, %v3600_v14  ;;  %v2329_v12 = vld [vmem:[%s4307_s7 + $0x4] ss:$0 sm:$0xff] }
 0x31f   :  { %2262 = vmatpush1.bf16.msra.mxu1 %v3301_v62 }
 0x320   :  { %2824 = vmatprep.subr.msk.bf16.mxu1 %vm2211_vm3, %v3304_v63 }
 0x323   :  { %2264 = vmatpush1.bf16.msra.mxu1 %v2213_v3 }
 0x324   :  { %2888 = vmatprep.subr.bf16.mxu1 %v3322_v8 }
 0x326   :  { %2825 = vmatmul.mubr.msk.bf16.vlgmr.msra.gmra.mrb[20].mxu1 %vm2207_vm4, %v1967_v4 }
 0x327   :  { %2889 = vmatpush3.bf16.msra.mxu1 %v2469_v10  ;;  %2890 = vmatprep.mubr.msk.bf16.mxu1 %vm3323_vm8, %v3322_v8 }
 0x3f9   :  { %v2293_v17 = vpop.f32.mrb[20].mxu1 }
 0x3fa   :  { %v2900_v18 = vadd.f32 %v2293_v17, %v2012_v15  ;;  %v2295_v19 = vpop.f32.mrb[21].mxu1 }
 0x3fb   :  { %v2901_v20 = vadd.f32 %v2295_v19, %v2016_v16  ;;  %v2297_v21 = vpop.f32.mrb[22].mxu1 }
 0x3fc   :  { %v2300_v23 = vmax.f32 %v2900_v18, 0.0  ;;  %v2298_v24 = vpop.f32.mrb[23].mxu1 }
 0x3fd   :  { %v2301_v25 = vmax.f32 %v2901_v20, 0.0 }
 0x3fe   :  { %v2302_v27 = vpack.c.bf16 %v2300_v23, %v2300_v23 }
 0x3ff   :  { %v2303_v26 = vpack.c.bf16 %v2301_v25, %v2301_v25 }
 0x401   :  { %2839 = vmatprep.mubr.msk.bf16.mxu0 %vm2405_vm7, %v2303_v26 }
 0x402   :  { %2446 = vmatmul.mubr.bf16.vlgmr.msra.gmra.mrb[8].mxu0 %v2302_v27 }
 0x4d5   :  { %v2447_v14 = vpop.f32.mrb[8].mxu0 }
 0x4d6   :  { %v2448_v29 = vadd.f32 %v2447_v14, %v2329_v12  ;;  %v2449_v30 = vpop.f32.mrb[9].mxu0 }
 0x4d7   :  { %v2450_v31 = vpop.f32.mrb[10].mxu0 }
 0x4d8   :  { %v2453_v32 = vmax.f32 %v2448_v29, 0.0  ;;  %v2451_v34 = vpop.f32.mrb[11].mxu0 }
 0x4da   :  { %v2454_v35 = vpack.c.bf16 %v2453_v32, %v2453_v32 }
 0x4dc   :  { %2891 = vmatmul.mubr.msk.bf16.vlgmr.msra.gmra.mrb[24].mxu1 %vm2463_vm9, %v2454_v35 }
 0x5af   :  { %v2505_v37 = vpop.f32.mrb[24].mxu1 }
 0x5b0   :  { %v2506_v38 = vadd.f32 %v2505_v37, %v2457_v36  ;;  %v2892_v13 = vpop.f32.mrb[25].mxu1 }
 0x5b1   :  { %v2508_v39 = vpop.f32.mrb[26].mxu1 }
 0x5b2   :  { %v2511_v40 = vmax.f32 %v2506_v38, 0.0  ;;  %v2893_v41 = vpop.f32.mrb[27].mxu1 }
 0x5b4   :  { %2514 = vperm.xlu1 %2925, %v2511_v40   ;;  %2518 = vrot.lane.b32.xlu0 %v2511_v40, %s3324_s23 }
 0x626   :  { %v2519_v42 = vpop.permute.xlu0 %2518 }
 0x627   :  { %v2522_v43 = vsel %vm2521_vm10, %v2519_v42, 0.0 }
 0x628   :  { %2523 = vadd.xlane.f32.xlu0 %v2522_v43 }
 0x633   :  { %v2515_v50 = vpop.permute.xlu1 %2514 }
 0x634   :  { %v2517_v51 = vadd.f32 %v2515_v50, %v2511_v40 }
 0x6b5   :  { %v2524_v44 = vpop.xlane.xlu0 %2523 }
 0x6b6   :  { %v2525_v45 = vrot.slane %v2524_v44, 4 }
 0x6b8   :  { %v2526_v46 = vadd.f32 %v2525_v45, %v2524_v44 }
 0x6ba   :  { %v2527_v47 = vrot.slane %v2526_v46, 2 }
 0x6bc   :  { %v2528_v33 = vadd.f32 %v2527_v47, %v2526_v46 }
 0x6be   :  { %v2529_v48 = vrot.slane %v2528_v33, 1 }
 0x6c0   :  { %v2530_v49 = vadd.f32 %v2529_v48, %v2528_v33 }
 0x6c2   :  { %2919 = vpush %v2530_v49 }
 0x6f3   :  { %s2920_s7 = spop %2919 }
 0x6f4   :  { %s2534_s24 = smul.f32 0.03125, %s2920_s7 }
 0x6f6   :  { %v2535_v52 = vstv %s2534_s24 }
 0x6f7   :  { %v2536_v53 = vsub.f32 %v2517_v51, %v2535_v52 }
 0x6f9   :  { %2538 = vrot.lane.b32.xlu1 %v2536_v53, %s3324_s23 }
 0x76b   :  { %v2539_v54 = vpop.permute.xlu1 %2538 }
 0x76c   :  { %2541 = vst.msk [vmem:[%s4311_s8] sm:$0xff] %vm2521_vm10, %v2539_v54 }

</bundles_post_ra>
